<compile_context>
chip_gen: v5e
topology: v5e:2x2
jax: 0.10.0
libtpu: 0.0.40
codegen_flags: <defaults>
</compile_context>

<pallas_src>
import jax
import jax.numpy as jnp
from jax.experimental import pallas as pl

# ----------------- small, module-consistent config -----------------
B      = 2            # batch
C      = 3            # image channels
IMG    = 32           # image spatial size (multiple of patch)
P      = 16           # ViT-B/16 patch size
D      = 32           # transformer hidden dim (small stand-in for 768)
HEADS  = 4
DH     = D // HEADS
DEPTH  = 2            # number of transformer blocks (small stand-in for 12)
MLP    = 4 * D        # mlp_ratio = 4
EMBED  = 16           # opt.embed_dim (head output dim)
N      = (IMG // P) ** 2      # 4 patches
S      = N + 1                # 5 real tokens (cls first)
SP     = 8                    # padded sequence length (sublane aligned)
BSP    = B * SP               # 16 rows in the fused token slab
CPP    = C * P * P            # 768
LN_EPS_MODEL = 1e-6           # timm ViT LayerNorms
LN_EPS_EXTRA = 1e-5           # the extra torch.nn.LayerNorm (default eps)

# packed per-layer weight slab (bf16): lanes [qkv(0:96) | proj(128:160) | fc1(256:384)]
QKV_OFF, PROJ_OFF, FC1_OFF, WA_LANES = 0, 128, 256, 384
# cvec (f32, 32-lane rows) row offsets
R_CLSPOS = 0
R_VECS   = BSP                  # per-layer: ln1_w ln1_b proj_b ln2_w ln2_b fc2_b
R_HVECS  = BSP + 6 * DEPTH      # norm_w norm_b ln_w ln_b
CVEC_ROWS = R_HVECS + 4
# cwide (f32, 128-lane rows) row offsets
ROW_QKVB = 0
ROW_FC1B = DEPTH
ROW_MASK = 2 * DEPTH
CWIDE_ROWS = 2 * DEPTH + BSP


# ----------------------------- kernel ------------------------------
def _layernorm(z, w, b, eps):
    mu = jnp.mean(z, axis=-1, keepdims=True)
    d = z - mu
    var = jnp.mean(d * d, axis=-1, keepdims=True)
    return d * jax.lax.rsqrt(var + eps) * w + b


def _gelu_exact(m):
    # exact-erf GELU (timm nn.GELU default) for parity with the PyTorch reference.
    return 0.5 * m * (1.0 + jax.lax.erf(m * (0.5 ** 0.5)))


def _split_heads(t):
    # (BSP, D) -> (HEADS, BSP, DH) via lane slices + leading-dim stack (no tiny matmuls)
    return jnp.stack([t[:, h * DH:(h + 1) * DH] for h in range(HEADS)], axis=0)


def fused_vit_kernel(xp_ref, pw_ref, wa_ref, fc2w_ref, cvec_ref, cwide_ref,
                     hwb_ref, o_ref):
    f32 = jnp.float32
    bf16 = jnp.bfloat16

    cvec = cvec_ref[...]      # (CVEC_ROWS, D)    f32 small constants
    cwide = cwide_ref[...]    # (CWIDE_ROWS, 128) f32 wide constants

    # ---- patch embedding: zero-padded token slab (BSP, CPP) @ (CPP, D), bf16 MXU/f32 acc.
    # cls/pad rows of xp are zero; cls+pos / pos+patch_bias are pre-packed in cvec rows 0:BSP,
    # so the result is already the assembled, position-embedded token slab.
    x = jnp.dot(xp_ref[...], pw_ref[...], preferred_element_type=f32) \
        + cvec[R_CLSPOS:R_CLSPOS + BSP, :]                              # (BSP, D) f32

    # 0/1 key mask (block-diagonal over batch, pad keys zeroed), precomputed host-side.
    mask3 = cwide[ROW_MASK:ROW_MASK + BSP, 0:BSP][None]                 # (1, BSP, BSP)

    dn_qkt = (((2,), (2,)), ((0,), (0,)))    # q @ k^T, batched over heads
    dn_pv  = (((2,), (1,)), ((0,), (0,)))    # p @ v,   batched over heads

    # DEPTH=2: static unroll is fine.
    # TODO(synk): for DEPTH ~12, switch to a grid axis over layers with streamed weights.
    for l in range(DEPTH):
        wa = wa_ref[l]                                   # (D, WA_LANES) bf16
        v0 = R_VECS + 6 * l
        ln1_w, ln1_b = cvec[v0 + 0:v0 + 1, :], cvec[v0 + 1:v0 + 2, :]
        proj_b       = cvec[v0 + 2:v0 + 3, :]
        ln2_w, ln2_b = cvec[v0 + 3:v0 + 4, :], cvec[v0 + 4:v0 + 5, :]
        fc2_b        = cvec[v0 + 5:v0 + 6, :]
        qkv_b = cwide[ROW_QKVB + l:ROW_QKVB + l + 1, 0:3 * D]   # (1, 3D), q-scale folded
        fc1_b = cwide[ROW_FC1B + l:ROW_FC1B + l + 1, :]         # (1, MLP)

        # --- attention ---
        h = _layernorm(x, ln1_w, ln1_b, LN_EPS_MODEL).astype(bf16)
        # one full-width QKV matmul; heads/q/k/v stacked along lanes, 1/sqrt(DH) in q cols.
        qkv = jnp.dot(h, wa[:, QKV_OFF:QKV_OFF + 3 * D],
                      preferred_element_type=f32) + qkv_b               # (BSP, 3D) f32
        qh = _split_heads(qkv[:, 0:D]).astype(bf16)                     # (H, BSP, DH)
        kh = _split_heads(qkv[:, D:2 * D]).astype(bf16)
        vh = _split_heads(qkv[:, 2 * D:3 * D]).astype(bf16)

        logits = jax.lax.dot_general(qh, kh, dn_qkt,
                                     preferred_element_type=f32)        # (H, BSP, BSP)
        # multiplicative mask after exp; max-subtraction dropped (logits pre-scaled, bounded)
        p = jnp.exp(logits) * mask3
        p = p * pl.reciprocal(jnp.sum(p, axis=-1, keepdims=True), approx=True)

        oh = jax.lax.dot_general(p.astype(bf16), vh, dn_pv,
                                 preferred_element_type=f32)            # (H, BSP, DH)
        # reassemble heads along lanes, then ONE full-width projection matmul
        o = jnp.concatenate([oh[hh] for hh in range(HEADS)], axis=-1).astype(bf16)
        x = x + jnp.dot(o, wa[:, PROJ_OFF:PROJ_OFF + D],
                        preferred_element_type=f32) + proj_b

        # --- MLP ---
        h2 = _layernorm(x, ln2_w, ln2_b, LN_EPS_MODEL).astype(bf16)
        m = jnp.dot(h2, wa[:, FC1_OFF:FC1_OFF + MLP],
                    preferred_element_type=f32) + fc1_b                 # (BSP, MLP)
        m = _gelu_exact(m).astype(bf16)
        x = x + jnp.dot(m, fc2w_ref[l], preferred_element_type=f32) + fc2_b

    # ---- head: [CLS] rows are 0 and SP ----
    cls = jnp.concatenate([x[0:1, :], x[SP:SP + 1, :]], axis=0)         # (B, D)
    hv0 = R_HVECS
    cls = _layernorm(cls, cvec[hv0 + 0:hv0 + 1, :], cvec[hv0 + 1:hv0 + 2, :],
                     LN_EPS_MODEL)                                      # model.norm
    # pre_logits = Identity
    cls = _layernorm(cls, cvec[hv0 + 2:hv0 + 3, :], cvec[hv0 + 3:hv0 + 4, :],
                     LN_EPS_EXTRA)                                      # extra layer_norm
    out = jnp.dot(cls, hwb_ref[0:D, :], preferred_element_type=jnp.float32) \
        + hwb_ref[D:D + 1, :]
    nrm = jnp.sqrt(jnp.sum(out * out, axis=-1, keepdims=True))
    o_ref[...] = out / jnp.maximum(nrm, 1e-12)                          # F.normalize


# ----------------------------- wrapper ------------------------------
def extract_patches(x):
    # x: (B, C, H, W) NCHW -> (B, N, C*P*P); matches Conv2d(k=P, s=P) + flatten(2).T
    hn, wn = IMG // P, IMG // P
    x = x.reshape(B, C, hn, P, wn, P)
    x = x.transpose(0, 2, 4, 1, 3, 5)          # (B, hn, wn, C, P, P)
    return x.reshape(B, hn * wn, C * P * P)


@jax.jit
def vit_forward(x, fp):
    # Zero-padded token slab: row b*SP (cls) and rows b*SP+S.. (pads) are zero, so the
    # in-kernel patch matmul lands tokens directly at their final rows (no scatter).
    xp = extract_patches(x)                                             # (B, N, CPP)
    xp_pad = jnp.zeros((B, SP, CPP), jnp.float32).at[:, 1:1 + N].set(xp)
    xp_pad = xp_pad.reshape(BSP, CPP).astype(jnp.bfloat16)
    return pl.pallas_call(
        fused_vit_kernel,
        out_shape=jax.ShapeDtypeStruct((B, EMBED), jnp.float32),
        # single invocation, all 7 operands whole-array resident in VMEM (<0.5 MiB total)
        # TODO(synk): on v7x (2 TensorCores) a ("parallel",) grid over batch would use both cores.
    )(xp_pad, fp['patch_w'], fp['w_a'], fp['fc2_w'],
      fp['cvec'], fp['cwide'], fp['head_wb'])


# ---------------------------- parameters -----------------------------
def init_params(key):
    # PyTorch/timm-like parameter layout (random init, self-consistent).
    keys = iter(jax.random.split(key, 64))
    nrm = lambda shape, s=0.02: (s * jax.random.normal(next(keys), shape)).astype(jnp.float32)
    params = {
        'patch_w': nrm((CPP, D)),          # Conv2d weight reshaped to (C*P*P, D)
        'patch_b': nrm((1, D)),
        'cls_token': nrm((1, 1, D)),
        'pos_embed': nrm((1, S, D)),
        'norm_w': jnp.ones((D,), jnp.float32), 'norm_b': jnp.zeros((D,), jnp.float32),
        'ln_w': jnp.ones((D,), jnp.float32), 'ln_b': jnp.zeros((D,), jnp.float32),
        'head_w': nrm((D, EMBED)), 'head_b': nrm((1, EMBED)),
        'blocks': [],
    }
    for _ in range(DEPTH):
        params['blocks'].append({
            'ln1_w': jnp.ones((D,), jnp.float32), 'ln1_b': jnp.zeros((D,), jnp.float32),
            'qkv_w': nrm((D, 3 * D)), 'qkv_b': nrm((3 * D,)),
            'proj_w': nrm((D, D)), 'proj_b': nrm((D,)),
            'ln2_w': jnp.ones((D,), jnp.float32), 'ln2_b': jnp.zeros((D,), jnp.float32),
            'fc1_w': nrm((D, MLP)), 'fc1_b': nrm((MLP,)),
            'fc2_w': nrm((MLP, D)), 'fc2_b': nrm((D,)),
        })
    return params


def prepare_fused_params(params):
    """One-time restructuring of torch-style params into the fused-kernel layout:
    bf16 lane-aligned weight slabs, 1/sqrt(DH) folded into q, all small f32
    constants packed into two lane-dense slabs, cls+pos+patch_bias precombined."""
    f32, bf16 = jnp.float32, jnp.bfloat16
    scale = DH ** -0.5

    wa_list, fc2_list = [], []
    qkvb_rows, fc1b_rows, vec_rows = [], [], []
    for blk in params['blocks']:
        wqkv = blk['qkv_w'].at[:, 0:D].multiply(scale)     # fold attn scale into q columns
        bqkv = blk['qkv_b'].at[0:D].multiply(scale)
        wa = jnp.zeros((D, WA_LANES), f32)
        wa = wa.at[:, QKV_OFF:QKV_OFF + 3 * D].set(wqkv)
        wa = wa.at[:, PROJ_OFF:PROJ_OFF + D].set(blk['proj_w'])
        wa = wa.at[:, FC1_OFF:FC1_OFF + MLP].set(blk['fc1_w'])
        wa_list.append(wa)
        fc2_list.append(blk['fc2_w'])
        qkvb_rows.append(jnp.zeros((128,), f32).at[0:3 * D].set(bqkv))
        fc1b_rows.append(blk['fc1_b'])
        vec_rows += [blk['ln1_w'], blk['ln1_b'], blk['proj_b'],
                     blk['ln2_w'], blk['ln2_b'], blk['fc2_b']]

    # cls/pos/patch-bias constant rows (BSP, D): row b*SP = cls+pos[0]; rows b*SP+1..N =
    # pos[1:] + patch_b (patch bias folded here, so the zero-padded patch matmul needs no
    # separate bias); pad rows stay zero.
    patch_b = params['patch_b'].reshape(D)
    cls_pos = jnp.zeros((SP, D), f32)
    cls_pos = cls_pos.at[0].set(params['cls_token'][0, 0] + params['pos_embed'][0, 0])
    cls_pos = cls_pos.at[1:S].set(params['pos_embed'][0, 1:S] + patch_b)
    cls_pos_full = jnp.tile(cls_pos, (B, 1))                            # (BSP, D)

    # 0/1 attention key mask: block-diagonal over batch; pad keys (col % SP >= S) masked.
    qr = jnp.arange(BSP)[:, None]
    kc = jnp.arange(BSP)[None, :]
    mask01 = ((qr // SP == kc // SP) & (kc % SP < S)).astype(f32)       # (BSP, BSP)

    cvec = jnp.concatenate([
        cls_pos_full,                                                   # rows 0:BSP
        jnp.stack(vec_rows, axis=0),                                    # rows R_VECS:+6*DEPTH
        jnp.stack([params['norm_w'], params['norm_b'],
                   params['ln_w'], params['ln_b']], axis=0),            # rows R_HVECS:+4
    ], axis=0)                                                          # (CVEC_ROWS, D)

    cwide = jnp.zeros((CWIDE_ROWS, 128), f32)
    cwide = cwide.at[ROW_QKVB:ROW_QKVB + DEPTH].set(jnp.stack(qkvb_rows, axis=0))
    cwide = cwide.at[ROW_FC1B:ROW_FC1B + DEPTH, 0:MLP].set(jnp.stack(fc1b_rows, axis=0))
    cwide = cwide.at[ROW_MASK:ROW_MASK + BSP, 0:BSP].set(mask01)

    head_wb = jnp.concatenate([params['head_w'],
                               params['head_b'].reshape(1, EMBED)], axis=0)   # (D+1, EMBED)

    return {
        'patch_w': params['patch_w'].astype(bf16),            # (CPP, D)       bf16
        'w_a': jnp.stack(wa_list, axis=0).astype(bf16),       # (DEPTH, D, 384) bf16
        'fc2_w': jnp.stack(fc2_list, axis=0).astype(bf16),    # (DEPTH, MLP, D) bf16
        'cvec': cvec,                                         # (CVEC_ROWS, D)  f32
        'cwide': cwide,                                       # (CWIDE_ROWS,128) f32
        'head_wb': head_wb,                                   # (D+1, EMBED)    f32
    }


if __name__ == "__main__":
    key = jax.random.PRNGKey(0)
    kx, kp = jax.random.split(key)
    x = jax.random.normal(kx, (B, C, IMG, IMG), dtype=jnp.float32)   # NCHW like PyTorch
    params = init_params(kp)
    fused_params = prepare_fused_params(params)   # one-time weight restructuring

    out = vit_forward(x, fused_params)
    out = jax.block_until_ready(out)

    assert out.shape == (B, EMBED), out.shape
    assert bool(jnp.all(jnp.isfinite(out)))
    norms = jnp.linalg.norm(out, axis=-1)
    assert bool(jnp.allclose(norms, 1.0, atol=1e-4)), norms   # F.normalize -> unit rows
    print("KERNEL_OK")
</pallas_src>

<mosaic_0001>
module attributes {stable_mosaic.version = 11 : i64} {
  func.func @fused_vit_kernel(%arg0: memref<16x768xbf16, #tpu.memory_space<vmem>>, %arg1: memref<768x32xbf16, #tpu.memory_space<vmem>>, %arg2: memref<2x32x384xbf16, #tpu.memory_space<vmem>>, %arg3: memref<2x128x32xbf16, #tpu.memory_space<vmem>>, %arg4: memref<32x32xf32, #tpu.memory_space<vmem>>, %arg5: memref<20x128xf32, #tpu.memory_space<vmem>>, %arg6: memref<33x16xf32, #tpu.memory_space<vmem>>, %arg7: memref<2x16xf32, #tpu.memory_space<vmem>>) attributes {dimension_semantics = [], scalar_prefetch = 0 : i64, scratch_operands = 0 : i64, tpu.core_type = #tpu.core_type<tc>} {
    %c0 = arith.constant 0 : index
    %c0_0 = arith.constant 0 : index
    %0 = vector.load %arg4[%c0, %c0_0] : memref<32x32xf32, #tpu.memory_space<vmem>>, vector<32x32xf32>
    %c0_1 = arith.constant 0 : index
    %c0_2 = arith.constant 0 : index
    %1 = vector.load %arg5[%c0_1, %c0_2] : memref<20x128xf32, #tpu.memory_space<vmem>>, vector<20x128xf32>
    %c0_3 = arith.constant 0 : index
    %c0_4 = arith.constant 0 : index
    %2 = vector.load %arg0[%c0_3, %c0_4] : memref<16x768xbf16, #tpu.memory_space<vmem>>, vector<16x768xbf16>
    %c0_5 = arith.constant 0 : index
    %c0_6 = arith.constant 0 : index
    %3 = vector.load %arg1[%c0_5, %c0_6] : memref<768x32xbf16, #tpu.memory_space<vmem>>, vector<768x32xbf16>
    %cst = arith.constant dense<0.000000e+00> : vector<16x32xf32>
    %4 = tpu.matmul %2, %3, %cst {dimension_numbers = #tpu.dot_dimension_numbers<[1], [0], [0], [1], [0, 0, 1, 1], [], []>} : vector<16x768xbf16>, vector<768x32xbf16>, vector<16x32xf32> -> vector<16x32xf32>
    %5 = vector.extract_strided_slice %0 {offsets = [0, 0], sizes = [16, 32], strides = [1, 1]} : vector<32x32xf32> to vector<16x32xf32>
    %6 = arith.addf %4, %5 : vector<16x32xf32>
    %7 = vector.extract_strided_slice %1 {offsets = [4, 0], sizes = [16, 16], strides = [1, 1]} : vector<20x128xf32> to vector<16x16xf32>
    %8 = vector.shape_cast %7 : vector<16x16xf32> to vector<1x16x16xf32>
    %c0_7 = arith.constant 0 : index
    %c0_8 = arith.constant 0 : index
    %c0_9 = arith.constant 0 : index
    %9 = vector.load %arg2[%c0_7, %c0_8, %c0_9] : memref<2x32x384xbf16, #tpu.memory_space<vmem>>, vector<1x32x384xbf16>
    %10 = vector.shape_cast %9 : vector<1x32x384xbf16> to vector<32x384xbf16>
    %11 = vector.extract_strided_slice %0 {offsets = [16, 0], sizes = [1, 32], strides = [1, 1]} : vector<32x32xf32> to vector<1x32xf32>
    %12 = vector.extract_strided_slice %0 {offsets = [17, 0], sizes = [1, 32], strides = [1, 1]} : vector<32x32xf32> to vector<1x32xf32>
    %13 = vector.extract_strided_slice %0 {offsets = [18, 0], sizes = [1, 32], strides = [1, 1]} : vector<32x32xf32> to vector<1x32xf32>
    %14 = vector.extract_strided_slice %0 {offsets = [19, 0], sizes = [1, 32], strides = [1, 1]} : vector<32x32xf32> to vector<1x32xf32>
    %15 = vector.extract_strided_slice %0 {offsets = [20, 0], sizes = [1, 32], strides = [1, 1]} : vector<32x32xf32> to vector<1x32xf32>
    %16 = vector.extract_strided_slice %0 {offsets = [21, 0], sizes = [1, 32], strides = [1, 1]} : vector<32x32xf32> to vector<1x32xf32>
    %17 = vector.extract_strided_slice %1 {offsets = [0, 0], sizes = [1, 96], strides = [1, 1]} : vector<20x128xf32> to vector<1x96xf32>
    %18 = vector.extract_strided_slice %1 {offsets = [2, 0], sizes = [1, 128], strides = [1, 1]} : vector<20x128xf32> to vector<1x128xf32>
    %cst_10 = arith.constant dense<0.000000e+00> : vector<16xf32>
    %19 = vector.multi_reduction <add>, %6, %cst_10 [1] : vector<16x32xf32> to vector<16xf32>
    %20 = vector.shape_cast %19 : vector<16xf32> to vector<16x1xf32>
    %cst_11 = arith.constant 3.200000e+01 : f32
    %21 = vector.broadcast %cst_11 : f32 to vector<16x1xf32>
    %22 = arith.divf %20, %21 : vector<16x1xf32>
    %23 = vector.broadcast %22 : vector<16x1xf32> to vector<16x32xf32>
    %24 = arith.subf %6, %23 : vector<16x32xf32>
    %25 = arith.mulf %24, %24 : vector<16x32xf32>
    %cst_12 = arith.constant dense<0.000000e+00> : vector<16xf32>
    %26 = vector.multi_reduction <add>, %25, %cst_12 [1] : vector<16x32xf32> to vector<16xf32>
    %27 = vector.shape_cast %26 : vector<16xf32> to vector<16x1xf32>
    %cst_13 = arith.constant 3.200000e+01 : f32
    %28 = vector.broadcast %cst_13 : f32 to vector<16x1xf32>
    %29 = arith.divf %27, %28 : vector<16x1xf32>
    %cst_14 = arith.constant 9.99999997E-7 : f32
    %30 = vector.broadcast %cst_14 : f32 to vector<16x1xf32>
    %31 = arith.addf %29, %30 : vector<16x1xf32>
    %32 = math.rsqrt %31 : vector<16x1xf32>
    %33 = vector.broadcast %32 : vector<16x1xf32> to vector<16x32xf32>
    %34 = arith.mulf %24, %33 : vector<16x32xf32>
    %35 = vector.broadcast %11 : vector<1x32xf32> to vector<16x32xf32>
    %36 = arith.mulf %34, %35 : vector<16x32xf32>
    %37 = vector.broadcast %12 : vector<1x32xf32> to vector<16x32xf32>
    %38 = arith.addf %36, %37 : vector<16x32xf32>
    %39 = arith.truncf %38 : vector<16x32xf32> to vector<16x32xbf16>
    %40 = vector.extract_strided_slice %10 {offsets = [0, 0], sizes = [32, 96], strides = [1, 1]} : vector<32x384xbf16> to vector<32x96xbf16>
    %cst_15 = arith.constant dense<0.000000e+00> : vector<16x96xf32>
    %41 = tpu.matmul %39, %40, %cst_15 {dimension_numbers = #tpu.dot_dimension_numbers<[1], [0], [0], [1], [0, 0, 1, 1], [], []>} : vector<16x32xbf16>, vector<32x96xbf16>, vector<16x96xf32> -> vector<16x96xf32>
    %42 = vector.broadcast %17 : vector<1x96xf32> to vector<16x96xf32>
    %43 = arith.addf %41, %42 : vector<16x96xf32>
    %44 = vector.extract_strided_slice %43 {offsets = [0, 0], sizes = [16, 32], strides = [1, 1]} : vector<16x96xf32> to vector<16x32xf32>
    %45 = vector.extract_strided_slice %44 {offsets = [0, 0], sizes = [16, 8], strides = [1, 1]} : vector<16x32xf32> to vector<16x8xf32>
    %46 = vector.extract_strided_slice %44 {offsets = [0, 8], sizes = [16, 8], strides = [1, 1]} : vector<16x32xf32> to vector<16x8xf32>
    %47 = vector.extract_strided_slice %44 {offsets = [0, 16], sizes = [16, 8], strides = [1, 1]} : vector<16x32xf32> to vector<16x8xf32>
    %48 = vector.extract_strided_slice %44 {offsets = [0, 24], sizes = [16, 8], strides = [1, 1]} : vector<16x32xf32> to vector<16x8xf32>
    %49 = vector.shape_cast %45 : vector<16x8xf32> to vector<1x16x8xf32>
    %50 = vector.shape_cast %46 : vector<16x8xf32> to vector<1x16x8xf32>
    %51 = vector.shape_cast %47 : vector<16x8xf32> to vector<1x16x8xf32>
    %52 = vector.shape_cast %48 : vector<16x8xf32> to vector<1x16x8xf32>
    %53 = tpu.concatenate %49, %50, %51, %52 in 0 : vector<1x16x8xf32>, vector<1x16x8xf32>, vector<1x16x8xf32>, vector<1x16x8xf32> -> vector<4x16x8xf32>
    %54 = arith.truncf %53 : vector<4x16x8xf32> to vector<4x16x8xbf16>
    %55 = vector.extract_strided_slice %43 {offsets = [0, 32], sizes = [16, 32], strides = [1, 1]} : vector<16x96xf32> to vector<16x32xf32>
    %56 = vector.extract_strided_slice %55 {offsets = [0, 0], sizes = [16, 8], strides = [1, 1]} : vector<16x32xf32> to vector<16x8xf32>
    %57 = vector.extract_strided_slice %55 {offsets = [0, 8], sizes = [16, 8], strides = [1, 1]} : vector<16x32xf32> to vector<16x8xf32>
    %58 = vector.extract_strided_slice %55 {offsets = [0, 16], sizes = [16, 8], strides = [1, 1]} : vector<16x32xf32> to vector<16x8xf32>
    %59 = vector.extract_strided_slice %55 {offsets = [0, 24], sizes = [16, 8], strides = [1, 1]} : vector<16x32xf32> to vector<16x8xf32>
    %60 = vector.shape_cast %56 : vector<16x8xf32> to vector<1x16x8xf32>
    %61 = vector.shape_cast %57 : vector<16x8xf32> to vector<1x16x8xf32>
    %62 = vector.shape_cast %58 : vector<16x8xf32> to vector<1x16x8xf32>
    %63 = vector.shape_cast %59 : vector<16x8xf32> to vector<1x16x8xf32>
    %64 = tpu.concatenate %60, %61, %62, %63 in 0 : vector<1x16x8xf32>, vector<1x16x8xf32>, vector<1x16x8xf32>, vector<1x16x8xf32> -> vector<4x16x8xf32>
    %65 = arith.truncf %64 : vector<4x16x8xf32> to vector<4x16x8xbf16>
    %66 = vector.extract_strided_slice %43 {offsets = [0, 64], sizes = [16, 32], strides = [1, 1]} : vector<16x96xf32> to vector<16x32xf32>
    %67 = vector.extract_strided_slice %66 {offsets = [0, 0], sizes = [16, 8], strides = [1, 1]} : vector<16x32xf32> to vector<16x8xf32>
    %68 = vector.extract_strided_slice %66 {offsets = [0, 8], sizes = [16, 8], strides = [1, 1]} : vector<16x32xf32> to vector<16x8xf32>
    %69 = vector.extract_strided_slice %66 {offsets = [0, 16], sizes = [16, 8], strides = [1, 1]} : vector<16x32xf32> to vector<16x8xf32>
    %70 = vector.extract_strided_slice %66 {offsets = [0, 24], sizes = [16, 8], strides = [1, 1]} : vector<16x32xf32> to vector<16x8xf32>
    %71 = vector.shape_cast %67 : vector<16x8xf32> to vector<1x16x8xf32>
    %72 = vector.shape_cast %68 : vector<16x8xf32> to vector<1x16x8xf32>
    %73 = vector.shape_cast %69 : vector<16x8xf32> to vector<1x16x8xf32>
    %74 = vector.shape_cast %70 : vector<16x8xf32> to vector<1x16x8xf32>
    %75 = tpu.concatenate %71, %72, %73, %74 in 0 : vector<1x16x8xf32>, vector<1x16x8xf32>, vector<1x16x8xf32>, vector<1x16x8xf32> -> vector<4x16x8xf32>
    %76 = arith.truncf %75 : vector<4x16x8xf32> to vector<4x16x8xbf16>
    %cst_16 = arith.constant dense<0.000000e+00> : vector<4x16x16xf32>
    %77 = tpu.matmul %54, %65, %cst_16 {dimension_numbers = #tpu.dot_dimension_numbers<[2], [2], [1], [1], [0, 0, 0, 1, 1, 1], [0], [0]>} : vector<4x16x8xbf16>, vector<4x16x8xbf16>, vector<4x16x16xf32> -> vector<4x16x16xf32>
    %78 = math.exp %77 : vector<4x16x16xf32>
    %79 = vector.broadcast %8 : vector<1x16x16xf32> to vector<4x16x16xf32>
    %80 = arith.mulf %78, %79 : vector<4x16x16xf32>
    %cst_17 = arith.constant dense<0.000000e+00> : vector<4x16xf32>
    %81 = vector.multi_reduction <add>, %80, %cst_17 [2] : vector<4x16x16xf32> to vector<4x16xf32>
    %82 = vector.shape_cast %81 : vector<4x16xf32> to vector<4x16x1xf32>
    %83 = tpu.reciprocal %82 {approx = true} : vector<4x16x1xf32> -> vector<4x16x1xf32>
    %84 = vector.broadcast %83 : vector<4x16x1xf32> to vector<4x16x16xf32>
    %85 = arith.mulf %80, %84 : vector<4x16x16xf32>
    %86 = arith.truncf %85 : vector<4x16x16xf32> to vector<4x16x16xbf16>
    %cst_18 = arith.constant dense<0.000000e+00> : vector<4x16x8xf32>
    %87 = tpu.matmul %86, %76, %cst_18 {dimension_numbers = #tpu.dot_dimension_numbers<[2], [1], [1], [2], [0, 0, 0, 1, 1, 2], [0], [0]>} : vector<4x16x16xbf16>, vector<4x16x8xbf16>, vector<4x16x8xf32> -> vector<4x16x8xf32>
    %88 = vector.extract_strided_slice %87 {offsets = [0, 0, 0], sizes = [1, 16, 8], strides = [1, 1, 1]} : vector<4x16x8xf32> to vector<1x16x8xf32>
    %89 = vector.shape_cast %88 : vector<1x16x8xf32> to vector<16x8xf32>
    %90 = vector.extract_strided_slice %87 {offsets = [1, 0, 0], sizes = [1, 16, 8], strides = [1, 1, 1]} : vector<4x16x8xf32> to vector<1x16x8xf32>
    %91 = vector.shape_cast %90 : vector<1x16x8xf32> to vector<16x8xf32>
    %92 = vector.extract_strided_slice %87 {offsets = [2, 0, 0], sizes = [1, 16, 8], strides = [1, 1, 1]} : vector<4x16x8xf32> to vector<1x16x8xf32>
    %93 = vector.shape_cast %92 : vector<1x16x8xf32> to vector<16x8xf32>
    %94 = vector.extract_strided_slice %87 {offsets = [3, 0, 0], sizes = [1, 16, 8], strides = [1, 1, 1]} : vector<4x16x8xf32> to vector<1x16x8xf32>
    %95 = vector.shape_cast %94 : vector<1x16x8xf32> to vector<16x8xf32>
    %96 = tpu.concatenate %89, %91, %93, %95 in 1 : vector<16x8xf32>, vector<16x8xf32>, vector<16x8xf32>, vector<16x8xf32> -> vector<16x32xf32>
    %97 = arith.truncf %96 : vector<16x32xf32> to vector<16x32xbf16>
    %98 = vector.extract_strided_slice %10 {offsets = [0, 128], sizes = [32, 32], strides = [1, 1]} : vector<32x384xbf16> to vector<32x32xbf16>
    %cst_19 = arith.constant dense<0.000000e+00> : vector<16x32xf32>
    %99 = tpu.matmul %97, %98, %cst_19 {dimension_numbers = #tpu.dot_dimension_numbers<[1], [0], [0], [1], [0, 0, 1, 1], [], []>} : vector<16x32xbf16>, vector<32x32xbf16>, vector<16x32xf32> -> vector<16x32xf32>
    %100 = arith.addf %6, %99 : vector<16x32xf32>
    %101 = vector.broadcast %13 : vector<1x32xf32> to vector<16x32xf32>
    %102 = arith.addf %100, %101 : vector<16x32xf32>
    %cst_20 = arith.constant dense<0.000000e+00> : vector<16xf32>
    %103 = vector.multi_reduction <add>, %102, %cst_20 [1] : vector<16x32xf32> to vector<16xf32>
    %104 = vector.shape_cast %103 : vector<16xf32> to vector<16x1xf32>
    %cst_21 = arith.constant 3.200000e+01 : f32
    %105 = vector.broadcast %cst_21 : f32 to vector<16x1xf32>
    %106 = arith.divf %104, %105 : vector<16x1xf32>
    %107 = vector.broadcast %106 : vector<16x1xf32> to vector<16x32xf32>
    %108 = arith.subf %102, %107 : vector<16x32xf32>
    %109 = arith.mulf %108, %108 : vector<16x32xf32>
    %cst_22 = arith.constant dense<0.000000e+00> : vector<16xf32>
    %110 = vector.multi_reduction <add>, %109, %cst_22 [1] : vector<16x32xf32> to vector<16xf32>
    %111 = vector.shape_cast %110 : vector<16xf32> to vector<16x1xf32>
    %cst_23 = arith.constant 3.200000e+01 : f32
    %112 = vector.broadcast %cst_23 : f32 to vector<16x1xf32>
    %113 = arith.divf %111, %112 : vector<16x1xf32>
    %cst_24 = arith.constant 9.99999997E-7 : f32
    %114 = vector.broadcast %cst_24 : f32 to vector<16x1xf32>
    %115 = arith.addf %113, %114 : vector<16x1xf32>
    %116 = math.rsqrt %115 : vector<16x1xf32>
    %117 = vector.broadcast %116 : vector<16x1xf32> to vector<16x32xf32>
    %118 = arith.mulf %108, %117 : vector<16x32xf32>
    %119 = vector.broadcast %14 : vector<1x32xf32> to vector<16x32xf32>
    %120 = arith.mulf %118, %119 : vector<16x32xf32>
    %121 = vector.broadcast %15 : vector<1x32xf32> to vector<16x32xf32>
    %122 = arith.addf %120, %121 : vector<16x32xf32>
    %123 = arith.truncf %122 : vector<16x32xf32> to vector<16x32xbf16>
    %124 = vector.extract_strided_slice %10 {offsets = [0, 256], sizes = [32, 128], strides = [1, 1]} : vector<32x384xbf16> to vector<32x128xbf16>
    %cst_25 = arith.constant dense<0.000000e+00> : vector<16x128xf32>
    %125 = tpu.matmul %123, %124, %cst_25 {dimension_numbers = #tpu.dot_dimension_numbers<[1], [0], [0], [1], [0, 0, 1, 1], [], []>} : vector<16x32xbf16>, vector<32x128xbf16>, vector<16x128xf32> -> vector<16x128xf32>
    %126 = vector.broadcast %18 : vector<1x128xf32> to vector<16x128xf32>
    %127 = arith.addf %125, %126 : vector<16x128xf32>
    %cst_26 = arith.constant 5.000000e-01 : f32
    %128 = vector.broadcast %cst_26 : f32 to vector<16x128xf32>
    %129 = arith.mulf %128, %127 : vector<16x128xf32>
    %cst_27 = arith.constant 0.707106769 : f32
    %130 = vector.broadcast %cst_27 : f32 to vector<16x128xf32>
    %131 = arith.mulf %127, %130 : vector<16x128xf32>
    %132 = math.erf %131 : vector<16x128xf32>
    %cst_28 = arith.constant 1.000000e+00 : f32
    %133 = vector.broadcast %cst_28 : f32 to vector<16x128xf32>
    %134 = arith.addf %133, %132 : vector<16x128xf32>
    %135 = arith.mulf %129, %134 : vector<16x128xf32>
    %136 = arith.truncf %135 : vector<16x128xf32> to vector<16x128xbf16>
    %c0_29 = arith.constant 0 : index
    %c0_30 = arith.constant 0 : index
    %c0_31 = arith.constant 0 : index
    %137 = vector.load %arg3[%c0_29, %c0_30, %c0_31] : memref<2x128x32xbf16, #tpu.memory_space<vmem>>, vector<1x128x32xbf16>
    %138 = vector.shape_cast %137 : vector<1x128x32xbf16> to vector<128x32xbf16>
    %cst_32 = arith.constant dense<0.000000e+00> : vector<16x32xf32>
    %139 = tpu.matmul %136, %138, %cst_32 {dimension_numbers = #tpu.dot_dimension_numbers<[1], [0], [0], [1], [0, 0, 1, 1], [], []>} : vector<16x128xbf16>, vector<128x32xbf16>, vector<16x32xf32> -> vector<16x32xf32>
    %140 = arith.addf %102, %139 : vector<16x32xf32>
    %141 = vector.broadcast %16 : vector<1x32xf32> to vector<16x32xf32>
    %142 = arith.addf %140, %141 : vector<16x32xf32>
    %c1 = arith.constant 1 : index
    %c0_33 = arith.constant 0 : index
    %c0_34 = arith.constant 0 : index
    %143 = vector.load %arg2[%c1, %c0_33, %c0_34] : memref<2x32x384xbf16, #tpu.memory_space<vmem>>, vector<1x32x384xbf16>
    %144 = vector.shape_cast %143 : vector<1x32x384xbf16> to vector<32x384xbf16>
    %145 = vector.extract_strided_slice %0 {offsets = [22, 0], sizes = [1, 32], strides = [1, 1]} : vector<32x32xf32> to vector<1x32xf32>
    %146 = vector.extract_strided_slice %0 {offsets = [23, 0], sizes = [1, 32], strides = [1, 1]} : vector<32x32xf32> to vector<1x32xf32>
    %147 = vector.extract_strided_slice %0 {offsets = [24, 0], sizes = [1, 32], strides = [1, 1]} : vector<32x32xf32> to vector<1x32xf32>
    %148 = vector.extract_strided_slice %0 {offsets = [25, 0], sizes = [1, 32], strides = [1, 1]} : vector<32x32xf32> to vector<1x32xf32>
    %149 = vector.extract_strided_slice %0 {offsets = [26, 0], sizes = [1, 32], strides = [1, 1]} : vector<32x32xf32> to vector<1x32xf32>
    %150 = vector.extract_strided_slice %0 {offsets = [27, 0], sizes = [1, 32], strides = [1, 1]} : vector<32x32xf32> to vector<1x32xf32>
    %151 = vector.extract_strided_slice %1 {offsets = [1, 0], sizes = [1, 96], strides = [1, 1]} : vector<20x128xf32> to vector<1x96xf32>
    %152 = vector.extract_strided_slice %1 {offsets = [3, 0], sizes = [1, 128], strides = [1, 1]} : vector<20x128xf32> to vector<1x128xf32>
    %cst_35 = arith.constant dense<0.000000e+00> : vector<16xf32>
    %153 = vector.multi_reduction <add>, %142, %cst_35 [1] : vector<16x32xf32> to vector<16xf32>
    %154 = vector.shape_cast %153 : vector<16xf32> to vector<16x1xf32>
    %cst_36 = arith.constant 3.200000e+01 : f32
    %155 = vector.broadcast %cst_36 : f32 to vector<16x1xf32>
    %156 = arith.divf %154, %155 : vector<16x1xf32>
    %157 = vector.broadcast %156 : vector<16x1xf32> to vector<16x32xf32>
    %158 = arith.subf %142, %157 : vector<16x32xf32>
    %159 = arith.mulf %158, %158 : vector<16x32xf32>
    %cst_37 = arith.constant dense<0.000000e+00> : vector<16xf32>
    %160 = vector.multi_reduction <add>, %159, %cst_37 [1] : vector<16x32xf32> to vector<16xf32>
    %161 = vector.shape_cast %160 : vector<16xf32> to vector<16x1xf32>
    %cst_38 = arith.constant 3.200000e+01 : f32
    %162 = vector.broadcast %cst_38 : f32 to vector<16x1xf32>
    %163 = arith.divf %161, %162 : vector<16x1xf32>
    %cst_39 = arith.constant 9.99999997E-7 : f32
    %164 = vector.broadcast %cst_39 : f32 to vector<16x1xf32>
    %165 = arith.addf %163, %164 : vector<16x1xf32>
    %166 = math.rsqrt %165 : vector<16x1xf32>
    %167 = vector.broadcast %166 : vector<16x1xf32> to vector<16x32xf32>
    %168 = arith.mulf %158, %167 : vector<16x32xf32>
    %169 = vector.broadcast %145 : vector<1x32xf32> to vector<16x32xf32>
    %170 = arith.mulf %168, %169 : vector<16x32xf32>
    %171 = vector.broadcast %146 : vector<1x32xf32> to vector<16x32xf32>
    %172 = arith.addf %170, %171 : vector<16x32xf32>
    %173 = arith.truncf %172 : vector<16x32xf32> to vector<16x32xbf16>
    %174 = vector.extract_strided_slice %144 {offsets = [0, 0], sizes = [32, 96], strides = [1, 1]} : vector<32x384xbf16> to vector<32x96xbf16>
    %cst_40 = arith.constant dense<0.000000e+00> : vector<16x96xf32>
    %175 = tpu.matmul %173, %174, %cst_40 {dimension_numbers = #tpu.dot_dimension_numbers<[1], [0], [0], [1], [0, 0, 1, 1], [], []>} : vector<16x32xbf16>, vector<32x96xbf16>, vector<16x96xf32> -> vector<16x96xf32>
    %176 = vector.broadcast %151 : vector<1x96xf32> to vector<16x96xf32>
    %177 = arith.addf %175, %176 : vector<16x96xf32>
    %178 = vector.extract_strided_slice %177 {offsets = [0, 0], sizes = [16, 32], strides = [1, 1]} : vector<16x96xf32> to vector<16x32xf32>
    %179 = vector.extract_strided_slice %178 {offsets = [0, 0], sizes = [16, 8], strides = [1, 1]} : vector<16x32xf32> to vector<16x8xf32>
    %180 = vector.extract_strided_slice %178 {offsets = [0, 8], sizes = [16, 8], strides = [1, 1]} : vector<16x32xf32> to vector<16x8xf32>
    %181 = vector.extract_strided_slice %178 {offsets = [0, 16], sizes = [16, 8], strides = [1, 1]} : vector<16x32xf32> to vector<16x8xf32>
    %182 = vector.extract_strided_slice %178 {offsets = [0, 24], sizes = [16, 8], strides = [1, 1]} : vector<16x32xf32> to vector<16x8xf32>
    %183 = vector.shape_cast %179 : vector<16x8xf32> to vector<1x16x8xf32>
    %184 = vector.shape_cast %180 : vector<16x8xf32> to vector<1x16x8xf32>
    %185 = vector.shape_cast %181 : vector<16x8xf32> to vector<1x16x8xf32>
    %186 = vector.shape_cast %182 : vector<16x8xf32> to vector<1x16x8xf32>
    %187 = tpu.concatenate %183, %184, %185, %186 in 0 : vector<1x16x8xf32>, vector<1x16x8xf32>, vector<1x16x8xf32>, vector<1x16x8xf32> -> vector<4x16x8xf32>
    %188 = arith.truncf %187 : vector<4x16x8xf32> to vector<4x16x8xbf16>
    %189 = vector.extract_strided_slice %177 {offsets = [0, 32], sizes = [16, 32], strides = [1, 1]} : vector<16x96xf32> to vector<16x32xf32>
    %190 = vector.extract_strided_slice %189 {offsets = [0, 0], sizes = [16, 8], strides = [1, 1]} : vector<16x32xf32> to vector<16x8xf32>
    %191 = vector.extract_strided_slice %189 {offsets = [0, 8], sizes = [16, 8], strides = [1, 1]} : vector<16x32xf32> to vector<16x8xf32>
    %192 = vector.extract_strided_slice %189 {offsets = [0, 16], sizes = [16, 8], strides = [1, 1]} : vector<16x32xf32> to vector<16x8xf32>
    %193 = vector.extract_strided_slice %189 {offsets = [0, 24], sizes = [16, 8], strides = [1, 1]} : vector<16x32xf32> to vector<16x8xf32>
    %194 = vector.shape_cast %190 : vector<16x8xf32> to vector<1x16x8xf32>
    %195 = vector.shape_cast %191 : vector<16x8xf32> to vector<1x16x8xf32>
    %196 = vector.shape_cast %192 : vector<16x8xf32> to vector<1x16x8xf32>
    %197 = vector.shape_cast %193 : vector<16x8xf32> to vector<1x16x8xf32>
    %198 = tpu.concatenate %194, %195, %196, %197 in 0 : vector<1x16x8xf32>, vector<1x16x8xf32>, vector<1x16x8xf32>, vector<1x16x8xf32> -> vector<4x16x8xf32>
    %199 = arith.truncf %198 : vector<4x16x8xf32> to vector<4x16x8xbf16>
    %200 = vector.extract_strided_slice %177 {offsets = [0, 64], sizes = [16, 32], strides = [1, 1]} : vector<16x96xf32> to vector<16x32xf32>
    %201 = vector.extract_strided_slice %200 {offsets = [0, 0], sizes = [16, 8], strides = [1, 1]} : vector<16x32xf32> to vector<16x8xf32>
    %202 = vector.extract_strided_slice %200 {offsets = [0, 8], sizes = [16, 8], strides = [1, 1]} : vector<16x32xf32> to vector<16x8xf32>
    %203 = vector.extract_strided_slice %200 {offsets = [0, 16], sizes = [16, 8], strides = [1, 1]} : vector<16x32xf32> to vector<16x8xf32>
    %204 = vector.extract_strided_slice %200 {offsets = [0, 24], sizes = [16, 8], strides = [1, 1]} : vector<16x32xf32> to vector<16x8xf32>
    %205 = vector.shape_cast %201 : vector<16x8xf32> to vector<1x16x8xf32>
    %206 = vector.shape_cast %202 : vector<16x8xf32> to vector<1x16x8xf32>
    %207 = vector.shape_cast %203 : vector<16x8xf32> to vector<1x16x8xf32>
    %208 = vector.shape_cast %204 : vector<16x8xf32> to vector<1x16x8xf32>
    %209 = tpu.concatenate %205, %206, %207, %208 in 0 : vector<1x16x8xf32>, vector<1x16x8xf32>, vector<1x16x8xf32>, vector<1x16x8xf32> -> vector<4x16x8xf32>
    %210 = arith.truncf %209 : vector<4x16x8xf32> to vector<4x16x8xbf16>
    %cst_41 = arith.constant dense<0.000000e+00> : vector<4x16x16xf32>
    %211 = tpu.matmul %188, %199, %cst_41 {dimension_numbers = #tpu.dot_dimension_numbers<[2], [2], [1], [1], [0, 0, 0, 1, 1, 1], [0], [0]>} : vector<4x16x8xbf16>, vector<4x16x8xbf16>, vector<4x16x16xf32> -> vector<4x16x16xf32>
    %212 = math.exp %211 : vector<4x16x16xf32>
    %213 = vector.broadcast %8 : vector<1x16x16xf32> to vector<4x16x16xf32>
    %214 = arith.mulf %212, %213 : vector<4x16x16xf32>
    %cst_42 = arith.constant dense<0.000000e+00> : vector<4x16xf32>
    %215 = vector.multi_reduction <add>, %214, %cst_42 [2] : vector<4x16x16xf32> to vector<4x16xf32>
    %216 = vector.shape_cast %215 : vector<4x16xf32> to vector<4x16x1xf32>
    %217 = tpu.reciprocal %216 {approx = true} : vector<4x16x1xf32> -> vector<4x16x1xf32>
    %218 = vector.broadcast %217 : vector<4x16x1xf32> to vector<4x16x16xf32>
    %219 = arith.mulf %214, %218 : vector<4x16x16xf32>
    %220 = arith.truncf %219 : vector<4x16x16xf32> to vector<4x16x16xbf16>
    %cst_43 = arith.constant dense<0.000000e+00> : vector<4x16x8xf32>
    %221 = tpu.matmul %220, %210, %cst_43 {dimension_numbers = #tpu.dot_dimension_numbers<[2], [1], [1], [2], [0, 0, 0, 1, 1, 2], [0], [0]>} : vector<4x16x16xbf16>, vector<4x16x8xbf16>, vector<4x16x8xf32> -> vector<4x16x8xf32>
    %222 = vector.extract_strided_slice %221 {offsets = [0, 0, 0], sizes = [1, 16, 8], strides = [1, 1, 1]} : vector<4x16x8xf32> to vector<1x16x8xf32>
    %223 = vector.shape_cast %222 : vector<1x16x8xf32> to vector<16x8xf32>
    %224 = vector.extract_strided_slice %221 {offsets = [1, 0, 0], sizes = [1, 16, 8], strides = [1, 1, 1]} : vector<4x16x8xf32> to vector<1x16x8xf32>
    %225 = vector.shape_cast %224 : vector<1x16x8xf32> to vector<16x8xf32>
    %226 = vector.extract_strided_slice %221 {offsets = [2, 0, 0], sizes = [1, 16, 8], strides = [1, 1, 1]} : vector<4x16x8xf32> to vector<1x16x8xf32>
    %227 = vector.shape_cast %226 : vector<1x16x8xf32> to vector<16x8xf32>
    %228 = vector.extract_strided_slice %221 {offsets = [3, 0, 0], sizes = [1, 16, 8], strides = [1, 1, 1]} : vector<4x16x8xf32> to vector<1x16x8xf32>
    %229 = vector.shape_cast %228 : vector<1x16x8xf32> to vector<16x8xf32>
    %230 = tpu.concatenate %223, %225, %227, %229 in 1 : vector<16x8xf32>, vector<16x8xf32>, vector<16x8xf32>, vector<16x8xf32> -> vector<16x32xf32>
    %231 = arith.truncf %230 : vector<16x32xf32> to vector<16x32xbf16>
    %232 = vector.extract_strided_slice %144 {offsets = [0, 128], sizes = [32, 32], strides = [1, 1]} : vector<32x384xbf16> to vector<32x32xbf16>
    %cst_44 = arith.constant dense<0.000000e+00> : vector<16x32xf32>
    %233 = tpu.matmul %231, %232, %cst_44 {dimension_numbers = #tpu.dot_dimension_numbers<[1], [0], [0], [1], [0, 0, 1, 1], [], []>} : vector<16x32xbf16>, vector<32x32xbf16>, vector<16x32xf32> -> vector<16x32xf32>
    %234 = arith.addf %142, %233 : vector<16x32xf32>
    %235 = vector.broadcast %147 : vector<1x32xf32> to vector<16x32xf32>
    %236 = arith.addf %234, %235 : vector<16x32xf32>
    %cst_45 = arith.constant dense<0.000000e+00> : vector<16xf32>
    %237 = vector.multi_reduction <add>, %236, %cst_45 [1] : vector<16x32xf32> to vector<16xf32>
    %238 = vector.shape_cast %237 : vector<16xf32> to vector<16x1xf32>
    %cst_46 = arith.constant 3.200000e+01 : f32
    %239 = vector.broadcast %cst_46 : f32 to vector<16x1xf32>
    %240 = arith.divf %238, %239 : vector<16x1xf32>
    %241 = vector.broadcast %240 : vector<16x1xf32> to vector<16x32xf32>
    %242 = arith.subf %236, %241 : vector<16x32xf32>
    %243 = arith.mulf %242, %242 : vector<16x32xf32>
    %cst_47 = arith.constant dense<0.000000e+00> : vector<16xf32>
    %244 = vector.multi_reduction <add>, %243, %cst_47 [1] : vector<16x32xf32> to vector<16xf32>
    %245 = vector.shape_cast %244 : vector<16xf32> to vector<16x1xf32>
    %cst_48 = arith.constant 3.200000e+01 : f32
    %246 = vector.broadcast %cst_48 : f32 to vector<16x1xf32>
    %247 = arith.divf %245, %246 : vector<16x1xf32>
    %cst_49 = arith.constant 9.99999997E-7 : f32
    %248 = vector.broadcast %cst_49 : f32 to vector<16x1xf32>
    %249 = arith.addf %247, %248 : vector<16x1xf32>
    %250 = math.rsqrt %249 : vector<16x1xf32>
    %251 = vector.broadcast %250 : vector<16x1xf32> to vector<16x32xf32>
    %252 = arith.mulf %242, %251 : vector<16x32xf32>
    %253 = vector.broadcast %148 : vector<1x32xf32> to vector<16x32xf32>
    %254 = arith.mulf %252, %253 : vector<16x32xf32>
    %255 = vector.broadcast %149 : vector<1x32xf32> to vector<16x32xf32>
    %256 = arith.addf %254, %255 : vector<16x32xf32>
    %257 = arith.truncf %256 : vector<16x32xf32> to vector<16x32xbf16>
    %258 = vector.extract_strided_slice %144 {offsets = [0, 256], sizes = [32, 128], strides = [1, 1]} : vector<32x384xbf16> to vector<32x128xbf16>
    %cst_50 = arith.constant dense<0.000000e+00> : vector<16x128xf32>
    %259 = tpu.matmul %257, %258, %cst_50 {dimension_numbers = #tpu.dot_dimension_numbers<[1], [0], [0], [1], [0, 0, 1, 1], [], []>} : vector<16x32xbf16>, vector<32x128xbf16>, vector<16x128xf32> -> vector<16x128xf32>
    %260 = vector.broadcast %152 : vector<1x128xf32> to vector<16x128xf32>
    %261 = arith.addf %259, %260 : vector<16x128xf32>
    %cst_51 = arith.constant 5.000000e-01 : f32
    %262 = vector.broadcast %cst_51 : f32 to vector<16x128xf32>
    %263 = arith.mulf %262, %261 : vector<16x128xf32>
    %cst_52 = arith.constant 0.707106769 : f32
    %264 = vector.broadcast %cst_52 : f32 to vector<16x128xf32>
    %265 = arith.mulf %261, %264 : vector<16x128xf32>
    %266 = math.erf %265 : vector<16x128xf32>
    %cst_53 = arith.constant 1.000000e+00 : f32
    %267 = vector.broadcast %cst_53 : f32 to vector<16x128xf32>
    %268 = arith.addf %267, %266 : vector<16x128xf32>
    %269 = arith.mulf %263, %268 : vector<16x128xf32>
    %270 = arith.truncf %269 : vector<16x128xf32> to vector<16x128xbf16>
    %c1_54 = arith.constant 1 : index
    %c0_55 = arith.constant 0 : index
    %c0_56 = arith.constant 0 : index
    %271 = vector.load %arg3[%c1_54, %c0_55, %c0_56] : memref<2x128x32xbf16, #tpu.memory_space<vmem>>, vector<1x128x32xbf16>
    %272 = vector.shape_cast %271 : vector<1x128x32xbf16> to vector<128x32xbf16>
    %cst_57 = arith.constant dense<0.000000e+00> : vector<16x32xf32>
    %273 = tpu.matmul %270, %272, %cst_57 {dimension_numbers = #tpu.dot_dimension_numbers<[1], [0], [0], [1], [0, 0, 1, 1], [], []>} : vector<16x128xbf16>, vector<128x32xbf16>, vector<16x32xf32> -> vector<16x32xf32>
    %274 = arith.addf %236, %273 : vector<16x32xf32>
    %275 = vector.broadcast %150 : vector<1x32xf32> to vector<16x32xf32>
    %276 = arith.addf %274, %275 : vector<16x32xf32>
    %277 = vector.extract_strided_slice %276 {offsets = [0, 0], sizes = [1, 32], strides = [1, 1]} : vector<16x32xf32> to vector<1x32xf32>
    %278 = vector.extract_strided_slice %276 {offsets = [8, 0], sizes = [1, 32], strides = [1, 1]} : vector<16x32xf32> to vector<1x32xf32>
    %279 = tpu.concatenate %277, %278 in 0 : vector<1x32xf32>, vector<1x32xf32> -> vector<2x32xf32>
    %280 = vector.extract_strided_slice %0 {offsets = [28, 0], sizes = [1, 32], strides = [1, 1]} : vector<32x32xf32> to vector<1x32xf32>
    %281 = vector.extract_strided_slice %0 {offsets = [29, 0], sizes = [1, 32], strides = [1, 1]} : vector<32x32xf32> to vector<1x32xf32>
    %cst_58 = arith.constant dense<0.000000e+00> : vector<2xf32>
    %282 = vector.multi_reduction <add>, %279, %cst_58 [1] : vector<2x32xf32> to vector<2xf32>
    %283 = vector.shape_cast %282 : vector<2xf32> to vector<2x1xf32>
    %cst_59 = arith.constant 3.200000e+01 : f32
    %284 = vector.broadcast %cst_59 : f32 to vector<2x1xf32>
    %285 = arith.divf %283, %284 : vector<2x1xf32>
    %286 = vector.broadcast %285 : vector<2x1xf32> to vector<2x32xf32>
    %287 = arith.subf %279, %286 : vector<2x32xf32>
    %288 = arith.mulf %287, %287 : vector<2x32xf32>
    %cst_60 = arith.constant dense<0.000000e+00> : vector<2xf32>
    %289 = vector.multi_reduction <add>, %288, %cst_60 [1] : vector<2x32xf32> to vector<2xf32>
    %290 = vector.shape_cast %289 : vector<2xf32> to vector<2x1xf32>
    %cst_61 = arith.constant 3.200000e+01 : f32
    %291 = vector.broadcast %cst_61 : f32 to vector<2x1xf32>
    %292 = arith.divf %290, %291 : vector<2x1xf32>
    %cst_62 = arith.constant 9.99999997E-7 : f32
    %293 = vector.broadcast %cst_62 : f32 to vector<2x1xf32>
    %294 = arith.addf %292, %293 : vector<2x1xf32>
    %295 = math.rsqrt %294 : vector<2x1xf32>
    %296 = vector.broadcast %295 : vector<2x1xf32> to vector<2x32xf32>
    %297 = arith.mulf %287, %296 : vector<2x32xf32>
    %298 = vector.broadcast %280 : vector<1x32xf32> to vector<2x32xf32>
    %299 = arith.mulf %297, %298 : vector<2x32xf32>
    %300 = vector.broadcast %281 : vector<1x32xf32> to vector<2x32xf32>
    %301 = arith.addf %299, %300 : vector<2x32xf32>
    %302 = vector.extract_strided_slice %0 {offsets = [30, 0], sizes = [1, 32], strides = [1, 1]} : vector<32x32xf32> to vector<1x32xf32>
    %303 = vector.extract_strided_slice %0 {offsets = [31, 0], sizes = [1, 32], strides = [1, 1]} : vector<32x32xf32> to vector<1x32xf32>
    %cst_63 = arith.constant dense<0.000000e+00> : vector<2xf32>
    %304 = vector.multi_reduction <add>, %301, %cst_63 [1] : vector<2x32xf32> to vector<2xf32>
    %305 = vector.shape_cast %304 : vector<2xf32> to vector<2x1xf32>
    %cst_64 = arith.constant 3.200000e+01 : f32
    %306 = vector.broadcast %cst_64 : f32 to vector<2x1xf32>
    %307 = arith.divf %305, %306 : vector<2x1xf32>
    %308 = vector.broadcast %307 : vector<2x1xf32> to vector<2x32xf32>
    %309 = arith.subf %301, %308 : vector<2x32xf32>
    %310 = arith.mulf %309, %309 : vector<2x32xf32>
    %cst_65 = arith.constant dense<0.000000e+00> : vector<2xf32>
    %311 = vector.multi_reduction <add>, %310, %cst_65 [1] : vector<2x32xf32> to vector<2xf32>
    %312 = vector.shape_cast %311 : vector<2xf32> to vector<2x1xf32>
    %cst_66 = arith.constant 3.200000e+01 : f32
    %313 = vector.broadcast %cst_66 : f32 to vector<2x1xf32>
    %314 = arith.divf %312, %313 : vector<2x1xf32>
    %cst_67 = arith.constant 9.99999974E-6 : f32
    %315 = vector.broadcast %cst_67 : f32 to vector<2x1xf32>
    %316 = arith.addf %314, %315 : vector<2x1xf32>
    %317 = math.rsqrt %316 : vector<2x1xf32>
    %318 = vector.broadcast %317 : vector<2x1xf32> to vector<2x32xf32>
    %319 = arith.mulf %309, %318 : vector<2x32xf32>
    %320 = vector.broadcast %302 : vector<1x32xf32> to vector<2x32xf32>
    %321 = arith.mulf %319, %320 : vector<2x32xf32>
    %322 = vector.broadcast %303 : vector<1x32xf32> to vector<2x32xf32>
    %323 = arith.addf %321, %322 : vector<2x32xf32>
    %c0_68 = arith.constant 0 : index
    %c0_69 = arith.constant 0 : index
    %324 = vector.load %arg6[%c0_68, %c0_69] : memref<33x16xf32, #tpu.memory_space<vmem>>, vector<32x16xf32>
    %cst_70 = arith.constant dense<0.000000e+00> : vector<2x16xf32>
    %325 = tpu.matmul %323, %324, %cst_70 {dimension_numbers = #tpu.dot_dimension_numbers<[1], [0], [0], [1], [0, 0, 1, 1], [], []>} : vector<2x32xf32>, vector<32x16xf32>, vector<2x16xf32> -> vector<2x16xf32>
    %c32 = arith.constant 32 : index
    %c0_71 = arith.constant 0 : index
    %326 = vector.load %arg6[%c32, %c0_71] : memref<33x16xf32, #tpu.memory_space<vmem>>, vector<1x16xf32>
    %327 = vector.broadcast %326 : vector<1x16xf32> to vector<2x16xf32>
    %328 = arith.addf %325, %327 : vector<2x16xf32>
    %329 = arith.mulf %328, %328 : vector<2x16xf32>
    %cst_72 = arith.constant dense<0.000000e+00> : vector<2xf32>
    %330 = vector.multi_reduction <add>, %329, %cst_72 [1] : vector<2x16xf32> to vector<2xf32>
    %331 = vector.shape_cast %330 : vector<2xf32> to vector<2x1xf32>
    %332 = math.sqrt %331 : vector<2x1xf32>
    %cst_73 = arith.constant 9.99999996E-13 : f32
    %333 = vector.broadcast %cst_73 : f32 to vector<2x1xf32>
    %334 = arith.maximumf %332, %333 : vector<2x1xf32>
    %335 = vector.broadcast %334 : vector<2x1xf32> to vector<2x16xf32>
    %336 = arith.divf %328, %335 : vector<2x16xf32>
    %c0_74 = arith.constant 0 : index
    %c0_75 = arith.constant 0 : index
    %337 = vector.load %arg7[%c0_74, %c0_75] : memref<2x16xf32, #tpu.memory_space<vmem>>, vector<2x16xf32>
    tpu.vector_store %arg7[%c0_74, %c0_75], %336 {strides = array<i32>} : memref<2x16xf32, #tpu.memory_space<vmem>>, vector<2x16xf32>,
    return
  }
}

</mosaic_0001>

<bundles_post_ra>
// kernel: vit_forward.1
= control target key start
LH: loop header
LB: loop body
LE: loop exit
PB: predicated region body
PF: predicated region fallthrough
CT: control target
= control target key end

     0   :  { %s3485_s0 = inlined_call_operand.vmem [shape: bf16[16,768], index: 0, kind: input, shape index: {}]   ;;  %s3486_s1 = inlined_call_operand.vmem [shape: bf16[768,32], index: 1, kind: input, shape index: {}]   ;;  %s3487_s2 = inlined_call_operand.vmem [shape: bf16[2,32,384], index: 2, kind: input, shape index: {}]   ;;  %s3488_s3 = inlined_call_operand.vmem [shape: bf16[2,128,32], index: 3, kind: input, shape index: {}]   ;;  %s3489_s4 = inlined_call_operand.vmem [shape: f32[32,32], index: 4, kind: input, shape index: {}]   ;;  %s3490_s5 = inlined_call_operand.vmem [shape: f32[20,128], index: 5, kind: input, shape index: {}]   ;;  %s3491_s6 = inlined_call_operand.vmem [shape: f32[33,16], index: 6, kind: input, shape index: {}]   ;;  %s3492_s7 = inlined_call_operand.hbm [shape: f32[2,16], index: 7, kind: output, shape index: {}]  }
   0x1   :  { %v2514_v0 = vld [vmem:[%s3486_s1 + $0x38] sm:$0xff]  ;;  %v2513_v4 = vld [vmem:[%s3486_s1 + $0x30] sm:$0xff]  ;;  %v2512_v8 = vld [vmem:[%s3486_s1 + $0x28] sm:$0xff] }
   0x2   :  { %v2522_v1 = vld [vmem:[%s3486_s1 + $0x78] sm:$0xff]  ;;  %455 = vmatpush.bf16.msra.mxu0 %v2514_v0  ;;  %v2521_v5 = vld [vmem:[%s3486_s1 + $0x70] sm:$0xff]  ;;  %v2520_v9 = vld [vmem:[%s3486_s1 + $0x68] sm:$0xff] }
   0x3   :  { %v2530_v2 = vld [vmem:[%s3486_s1 + $0xb8] sm:$0xff]  ;;  %469 = vmatpush.bf16.msra.mxu1 %v2522_v1  ;;  %v2529_v6 = vld [vmem:[%s3486_s1 + $0xb0] sm:$0xff]  ;;  %v2528_v10 = vld [vmem:[%s3486_s1 + $0xa8] sm:$0xff] }
   0x4   :  { %v2538_v3 = vld [vmem:[%s3486_s1 + $0xf8] sm:$0xff]  ;;  %483 = vmatpush.bf16.msra.mxu2 %v2530_v2  ;;  %v2537_v7 = vld [vmem:[%s3486_s1 + $0xf0] sm:$0xff]  ;;  %v2536_v11 = vld [vmem:[%s3486_s1 + $0xe8] sm:$0xff] }
   0x5   :  { %497 = vmatpush.bf16.msra.mxu3 %v2538_v3  ;;  %v2511_v12 = vld [vmem:[%s3486_s1 + $0x20] sm:$0xff]  ;;  %v2510_v16 = vld [vmem:[%s3486_s1 + $0x18] sm:$0xff] }
   0x6   :  { %456 = vmatpush.bf16.msra.mxu0 %v2513_v4  ;;  %v2519_v13 = vld [vmem:[%s3486_s1 + $0x60] sm:$0xff]  ;;  %v2518_v17 = vld [vmem:[%s3486_s1 + $0x58] sm:$0xff] }
   0x7   :  { %470 = vmatpush.bf16.msra.mxu1 %v2521_v5  ;;  %v2527_v14 = vld [vmem:[%s3486_s1 + $0xa0] sm:$0xff]  ;;  %v2526_v18 = vld [vmem:[%s3486_s1 + $0x98] sm:$0xff] }
   0x8   :  { %484 = vmatpush.bf16.msra.mxu2 %v2529_v6  ;;  %v2535_v15 = vld [vmem:[%s3486_s1 + $0xe0] sm:$0xff]  ;;  %v2534_v19 = vld [vmem:[%s3486_s1 + $0xd8] sm:$0xff] }
   0x9   :  { %498 = vmatpush.bf16.msra.mxu3 %v2537_v7 }
   0xa   :  { %457 = vmatpush.bf16.msra.mxu0 %v2512_v8 }
   0xb   :  { %471 = vmatpush.bf16.msra.mxu1 %v2520_v9 }
   0xc   :  { %485 = vmatpush.bf16.msra.mxu2 %v2528_v10 }
   0xd   :  { %499 = vmatpush.bf16.msra.mxu3 %v2536_v11 }
   0xe   :  { %458 = vmatpush.bf16.msra.mxu0 %v2511_v12 }
   0xf   :  { %472 = vmatpush.bf16.msra.mxu1 %v2519_v13 }
  0x10   :  { %486 = vmatpush.bf16.msra.mxu2 %v2527_v14 }
  0x11   :  { %500 = vmatpush.bf16.msra.mxu3 %v2535_v15 }
  0x12   :  { %12 = vsyncpa [#allocation3], 0  ;;  %459 = vmatpush.bf16.msra.mxu0 %v2510_v16  ;;  %v2509_v20 = vld [vmem:[%s3486_s1 + $0x10] sm:$0xff]  ;;  %v2508_v24 = vld [vmem:[%s3486_s1 + $0x8] sm:$0xff]  ;;  %vm547_vm0 = vcmask 261120   ;;  %s2780_s20 = smov 104  }
  0x13   :  { %473 = vmatpush.bf16.msra.mxu1 %v2518_v17  ;;  %v2517_v21 = vld [vmem:[%s3486_s1 + $0x50] sm:$0xff]  ;;  %v2516_v25 = vld [vmem:[%s3486_s1 + $0x48] sm:$0xff]  ;;  %v2507_v28 = vld [vmem:[%s3486_s1] sm:$0xff]  ;;  %s2781_s21 = smov 120   ;;  %s2782_s22 = smov 96   ;;  %vm671_vm8 = vcmask 64512  }
  0x14   :  { %487 = vmatpush.bf16.msra.mxu2 %v2526_v18  ;;  %v2525_v22 = vld [vmem:[%s3486_s1 + $0x90] sm:$0xff]  ;;  %v2524_v26 = vld [vmem:[%s3486_s1 + $0x88] sm:$0xff]  ;;  %v2515_v29 = vld [vmem:[%s3486_s1 + $0x40] sm:$0xff]  ;;  %s2783_s23 = smov 112   ;;  %vm792_vm9 = vcmask 1043456   ;;  %vm808_vm10 = vcmask 130048  }
  0x15   :  { %501 = vmatpush.bf16.msra.mxu3 %v2534_v19  ;;  %v2533_v23 = vld [vmem:[%s3486_s1 + $0xd0] sm:$0xff]  ;;  %v2532_v27 = vld [vmem:[%s3486_s1 + $0xc8] sm:$0xff]  ;;  %v2124_v30 = vld [vmem:[%s3485_s0] sm:$0xf]  ;;  %s2784_s28 = smov 64   ;;  %s2786_s29 = smov 16  }
  0x16   :  { %460 = vmatpush.bf16.msra.mxu0 %v2509_v20  ;;  %v2504_v31 = vld [vmem:[%s3485_s0 + $0x14] sm:$0xf0]  ;;  %v2501_v32 = vld [vmem:[%s3485_s0 + $0x4] sm:$0xf]  ;;  %v2126_v33 = vld [vmem:[%s3485_s0 + $0x18] sm:$0xf0] }
  0x17   :  { %474 = vmatpush.bf16.msra.mxu1 %v2517_v21  ;;  %v2546_v34 = vld [vmem:[%s3486_s1 + $0x138] sm:$0xff]  ;;  %v2523_v36 = vld [vmem:[%s3486_s1 + $0x80] sm:$0xff]  ;;  %v2132_v38 = vld [vmem:[%s3485_s0 + $0x8] sm:$0xf]  ;;  %v2125_v40 = vor.u32 %v2504_v31, %v2124_v30  ;;  %v2129_v43 = vor.u32 %v2501_v32, %v2126_v33  ;;  %v2779_v30 = vmov 32.0   ;;  %s2787_s30 = smov 24  }
  0x18   :  { %488 = vmatpush.bf16.msra.mxu2 %v2525_v22  ;;  %v2554_v35 = vld [vmem:[%s3486_s1 + $0x178] sm:$0xff]  ;;  %v2531_v37 = vld [vmem:[%s3486_s1 + $0xc0] sm:$0xff]  ;;  %v2502_v41 = vld [vmem:[%s3485_s0 + $0xc] sm:$0xf]  ;;  %2654 = vrcp.f32 %v2779_v30  ;;  %vm985_vm11 = vcmask 195584   ;;  %s2113_s27 = sshll.u32 %s3492_s7, 4  ;;  %s2114_s27 = int_to_ptr.hbm [resolvable:$true] %s2113_s27 }
  0x19   :  { %502 = vmatpush.bf16.msra.mxu3 %v2533_v23  ;;  %v2505_v39 = vld [vmem:[%s3485_s0 + $0x1c] sm:$0xf0]  ;;  %v2134_v42 = vld [vmem:[%s3485_s0 + $0x20] sm:$0xf0]  ;;  %v2545_v44 = vld [vmem:[%s3486_s1 + $0x130] sm:$0xff] }
  0x1a   :  { %461 = vmatpush.bf16.msra.mxu0 %v2508_v24  ;;  %v2553_v45 = vld [vmem:[%s3486_s1 + $0x170] sm:$0xff]  ;;  %v2133_v46 = vor.u32 %v2505_v39, %v2132_v38  ;;  %v2137_v47 = vor.u32 %v2502_v41, %v2134_v42  ;;  %v2544_v48 = vld [vmem:[%s3486_s1 + $0x128] sm:$0xff]  ;;  %v2543_v50 = vld [vmem:[%s3486_s1 + $0x120] sm:$0xff] }
  0x1b   :  { %475 = vmatpush.bf16.msra.mxu1 %v2516_v25  ;;  %v2552_v49 = vld [vmem:[%s3486_s1 + $0x168] sm:$0xff]  ;;  %v2551_v51 = vld [vmem:[%s3486_s1 + $0x160] sm:$0xff]  ;;  %v2542_v52 = vld [vmem:[%s3486_s1 + $0x118] sm:$0xff] }
  0x1c   :  { %489 = vmatpush.bf16.msra.mxu2 %v2524_v26  ;;  %v2550_v53 = vld [vmem:[%s3486_s1 + $0x158] sm:$0xff]  ;;  %v2541_v54 = vld [vmem:[%s3486_s1 + $0x110] sm:$0xff]  ;;  %v2540_v56 = vld [vmem:[%s3486_s1 + $0x108] sm:$0xff] }
  0x1d   :  { %503 = vmatpush.bf16.msra.mxu3 %v2532_v27  ;;  %v2549_v55 = vld [vmem:[%s3486_s1 + $0x150] sm:$0xff]  ;;  %v2548_v57 = vld [vmem:[%s3486_s1 + $0x148] sm:$0xff]  ;;  %v2539_v58 = vld [vmem:[%s3486_s1 + $0x100] sm:$0xff] }
  0x1e   :  { %462 = vmatpush.bf16.msra.mxu0 %v2507_v28  ;;  %v2547_v59 = vld [vmem:[%s3486_s1 + $0x140] sm:$0xff]  ;;  %v2140_v60 = vld [vmem:[%s3485_s0 + $0x10] sm:$0xf]  ;;  %v2506_v61 = vld [vmem:[%s3485_s0 + $0x24] sm:$0xf0]  ;;  %v2655_v31 = vpop.eup %2654  ;;  %s2785_s1 = smov 8  }
  0x1f   :  { %476 = vmatpush.bf16.msra.mxu1 %v2515_v29  ;;  %v2503_v62 = vld [vmem:[%s3485_s0 + $0x14] sm:$0xf]  ;;  %v2142_v63 = vld [vmem:[%s3485_s0 + $0x28] sm:$0xf0]  ;;  %v2141_v0 = vor.u32 %v2506_v61, %v2140_v60  ;;  %v28_v4 = vld [vmem:[%s3489_s4] sm:$0xff]  ;;  %v555_v32 = vmul.f32 32.0, %v2655_v31  ;;  %vm559_vm1 = vweird.f32 %v2655_v31 }
  0x20   :  { %490 = vmatpush.bf16.msra.mxu2 %v2523_v36  ;;  %v2145_v1 = vor.u32 %v2503_v62, %v2142_v63  ;;  %v29_v8 = vld [vmem:[%s3489_s4 + $0x8] sm:$0xff] }
  0x21   :  { %504 = vmatpush.bf16.msra.mxu3 %v2531_v37  ;;  %463 = vmatmul.bf16.vlgmr.msra.gmra.mxu0 %v2125_v40  ;;  %v556_v33 = vsub.f32 1.0, %v555_v32 }
  0x22   :  { %511 = vmatpush.bf16.msrb.mxu0 %v2546_v34  ;;  %477 = vmatmul.bf16.vlgmr.msra.gmra.mxu1 %v2129_v43 }
  0x23   :  { %525 = vmatpush.bf16.msrb.mxu1 %v2554_v35  ;;  %491 = vmatmul.bf16.vlgmr.msra.gmra.mxu2 %v2133_v46  ;;  %v557_v34 = vmul.f32 %v2655_v31, %v556_v33 }
  0x24   :  { %505 = vmatmul.bf16.vlgmr.msra.gmra.mxu3 %v2137_v47  ;;  %v2344_v47 = vld [vmem:[%s3487_s2 + $0x18] sm:$0xf] }
  0x25   :  { %v558_v35 = vadd.f32 %v2655_v31, %v557_v34 }
  0x26   :  { %512 = vmatpush.bf16.msrb.mxu0 %v2545_v44 }
  0x27   :  { %526 = vmatpush.bf16.msrb.mxu1 %v2553_v45  ;;  %v3023_v36 = vsel %vm559_vm1, %v2655_v31, %v558_v35 }
  0x2a   :  { %513 = vmatpush.bf16.msrb.mxu0 %v2544_v48  ;;  %v2559_v48 = vld [vmem:[%s3487_s2 + $0x20] sm:$0xf0] }
  0x2b   :  { %527 = vmatpush.bf16.msrb.mxu1 %v2552_v49  ;;  %v2345_v49 = vor.u32 %v2559_v48, %v2344_v47 }
  0x2d   :  { %628 = vmatpush.bf16.msrb.mxu2 %v2345_v49 }
  0x2e   :  { %514 = vmatpush.bf16.msrb.mxu0 %v2543_v50  ;;  %v2340_v50 = vld [vmem:[%s3487_s2] sm:$0xf] }
  0x2f   :  { %528 = vmatpush.bf16.msrb.mxu1 %v2551_v51  ;;  %v2556_v51 = vld [vmem:[%s3487_s2 + $0x8] sm:$0xf0] }
  0x32   :  { %515 = vmatpush.bf16.msrb.mxu0 %v2542_v52 }
  0x33   :  { %529 = vmatpush.bf16.msrb.mxu1 %v2550_v53  ;;  %v2341_v53 = vor.u32 %v2556_v51, %v2340_v50 }
  0x35   :  { %629 = vmatpush.bf16.msrb.mxu2 %v2341_v53 }
  0x36   :  { %516 = vmatpush.bf16.msrb.mxu0 %v2541_v54 }
  0x37   :  { %530 = vmatpush.bf16.msrb.mxu1 %v2549_v55 }
  0x3a   :  { %517 = vmatpush.bf16.msrb.mxu0 %v2540_v56 }
  0x3b   :  { %531 = vmatpush.bf16.msrb.mxu1 %v2548_v57 }
  0x3e   :  { %518 = vmatpush.bf16.msrb.mxu0 %v2539_v58 }
  0x3f   :  { %532 = vmatpush.bf16.msrb.mxu1 %v2547_v59 }
  0x41   :  { %519 = vmatmul.bf16.vlgmr.msrb.gmra.mxu0 %v2141_v0 }
  0x42   :  { %533 = vmatmul.bf16.vlgmr.msrb.gmra.mxu1 %v2145_v1 }
  0x9e   :  { %v464_v2 = vpop.f32.mrf.mxu0 }
  0x9f   :  { %v478_v3 = vpop.f32.mrf.mxu1  ;;  %v465_v5 = vadd.f32 %v464_v2, %v28_v4 }
  0xa1   :  { %v479_v7 = vadd.f32 %v478_v3, %v465_v5 }
  0xa6   :  { %v492_v6 = vpop.f32.mrf.mxu2  ;;  %v466_v9 = vpop.f32.mrf.mxu0 }
  0xa7   :  { %v480_v10 = vpop.f32.mrf.mxu1  ;;  %v506_v11 = vpop.f32.mrf.mxu3  ;;  %v493_v12 = vadd.f32 %v492_v6, %v479_v7  ;;  %v467_v13 = vadd.f32 %v466_v9, %v29_v8  ;;  %v3048_v6 = vld [vmem:[%s3489_s4 + $0x10] sm:$0xff] }
  0xa8   :  { %v599_v9 = vperm.slane %v3048_v6, 0 }
  0xa9   :  { %v507_v14 = vadd.f32 %v506_v11, %v493_v12  ;;  %v481_v15 = vadd.f32 %v480_v10, %v467_v13 }
  0xae   :  { %v494_v16 = vpop.f32.mrf.mxu2 }
  0xaf   :  { %v495_v20 = vadd.f32 %v494_v16, %v481_v15  ;;  %v508_v22 = vpop.f32.mrf.mxu3 }
  0xb1   :  { %v509_v24 = vadd.f32 %v508_v22, %v495_v20 }
  0xbe   :  { %v520_v17 = vpop.f32.mrf.mxu0 }
  0xbf   :  { %v534_v18 = vpop.f32.mrf.mxu1  ;;  %v521_v19 = vadd.f32 %v520_v17, %v507_v14  ;;  %v602_v14 = vperm.slane %v3048_v6, 1 }
  0xc1   :  { %v3015_v21 = vadd.f32 %v534_v18, %v521_v19  ;;  %v3056_v19 = vld [vmem:[%s3490_s5] sm:$0xff] }
  0xc2   :  { %v606_v22 = vperm.slane %v3056_v19, 0 }
  0xc3   :  { %v548_v23 = vsel %vm547_vm0, %v3015_v21, 0.0 }
  0xc4   :  { %549 = vadd.xlane.f32.xlu0 %v548_v23 }
  0xc6   :  { %v522_v25 = vpop.f32.mrf.mxu0 }
  0xc7   :  { %v523_v26 = vadd.f32 %v522_v25, %v509_v24  ;;  %v536_v27 = vpop.f32.mrf.mxu1 }
  0xc9   :  { %v3019_v28 = vadd.f32 %v536_v27, %v523_v26 }
  0xcb   :  { %v551_v29 = vsel %vm547_vm0, %v3019_v28, 0.0 }
  0xcc   :  { %552 = vadd.xlane.f32.xlu0 %v551_v29 }
 0x137   :  { %v550_v37 = vpop.xlane.xlu0 %549 }
 0x138   :  { %v561_v38 = vmul.f32 %v3023_v36, %v550_v37 }
 0x13a   :  { %v563_v39 = vsub.f32 %v3015_v21, %v561_v38 }
 0x13c   :  { %v565_v40 = vmul.f32 %v563_v39, %v563_v39 }
 0x13e   :  { %v567_v41 = vsel %vm547_vm0, %v565_v40, 0.0 }
 0x13f   :  { %568 = vadd.xlane.f32.xlu1 %v567_v41  ;;  %v553_v42 = vpop.xlane.xlu0 %552 }
 0x140   :  { %v562_v43 = vmul.f32 %v3023_v36, %v553_v42 }
 0x142   :  { %v564_v44 = vsub.f32 %v3019_v28, %v562_v43 }
 0x144   :  { %v566_v45 = vmul.f32 %v564_v44, %v564_v44 }
 0x146   :  { %v570_v46 = vsel %vm547_vm0, %v566_v45, 0.0 }
 0x147   :  { %571 = vadd.xlane.f32.xlu1 %v570_v46 }
 0x1b2   :  { %v569_v52 = vpop.xlane.xlu1 %568 }
 0x1b3   :  { %v573_v54 = vmul.f32 %v569_v52, %v3023_v36 }
 0x1b5   :  { %v575_v55 = vadd.f32 1e-06, %v573_v54 }
 0x1b7   :  { %2656 = vrsqrt.f32 %v575_v55  ;;  %vm583_vm3 = vweird.f32 %v575_v55 }
 0x1ba   :  { %v572_v56 = vpop.xlane.xlu1 %571 }
 0x1bb   :  { %v574_v57 = vmul.f32 %v572_v56, %v3023_v36 }
 0x1bd   :  { %v2657_v58 = vpop.eup %2656  ;;  %v576_v59 = vadd.f32 1e-06, %v574_v57 }
 0x1be   :  { %v578_v60 = vmul.f32 %v2657_v58, %v575_v55  ;;  %vm584_vm2 = vweird.f32 %v2657_v58 }
 0x1bf   :  { %2658 = vrsqrt.f32 %v576_v59  ;;  %vm585_vm4 = vmor %vm583_vm3, %vm584_vm2  ;;  %vm593_vm6 = vweird.f32 %v576_v59 }
 0x1c0   :  { %v579_v61 = vmul.f32 %v2657_v58, %v578_v60 }
 0x1c2   :  { %v580_v62 = vmul.f32 0.5, %v579_v61 }
 0x1c4   :  { %v581_v63 = vsub.f32 1.5, %v580_v62 }
 0x1c5   :  { %v2659_v0 = vpop.eup %2658 }
 0x1c6   :  { %v582_v1 = vmul.f32 %v2657_v58, %v581_v63  ;;  %v588_v2 = vmul.f32 %v2659_v0, %v576_v59  ;;  %vm594_vm5 = vweird.f32 %v2659_v0 }
 0x1c7   :  { %vm595_vm7 = vmor %vm593_vm6, %vm594_vm5 }
 0x1c8   :  { %v589_v3 = vmul.f32 %v2659_v0, %v588_v2  ;;  %v586_v4 = vsel %vm585_vm4, %v2657_v58, %v582_v1 }
 0x1c9   :  { %v597_v8 = vmul.f32 %v586_v4, %v563_v39 }
 0x1ca   :  { %v590_v5 = vmul.f32 0.5, %v589_v3 }
 0x1cb   :  { %v600_v13 = vmul.f32 %v599_v9, %v597_v8  ;;  %v793_v8 = vrot.slane %v3056_v19, 4 }
 0x1cc   :  { %v591_v7 = vsub.f32 1.5, %v590_v5 }
 0x1cd   :  { %v603_v16 = vadd.f32 %v602_v14, %v600_v13 }
 0x1ce   :  { %v592_v10 = vmul.f32 %v2659_v0, %v591_v7  ;;  %v33_v7 = vld [vmem:[%s3490_s5 + $0x8] sm:$0xff] }
 0x1d0   :  { %v596_v11 = vsel %vm595_vm7, %v2659_v0, %v592_v10 }
 0x1d1   :  { %v598_v12 = vmul.f32 %v596_v11, %v564_v44 }
 0x1d3   :  { %v601_v15 = vmul.f32 %v599_v9, %v598_v12  ;;  %v794_v9 = vrot.slane %v33_v7, 4 }
 0x1d5   :  { %v604_v17 = vadd.f32 %v602_v14, %v601_v15  ;;  %v3095_v15 = vsel %vm792_vm9, %v793_v8, %v794_v9 }
 0x1d7   :  { %v605_v18 = vpack.c.bf16 %v604_v17, %v603_v16  ;;  %v34_v17 = vld [vmem:[%s3490_s5 + $0x10] sm:$0xf] }
 0x1d9   :  { %2346 = vmatmul.msk.bf16.vlgmr.msrb.gmra.mxu2 %vm547_vm0, %v605_v18 }
 0x25c   :  { %v631_v20 = vpop.f32.mrf.mxu2 }
 0x25d   :  { %v632_v23 = vadd.f32 %v631_v20, %v606_v22  ;;  %v796_v20 = vrot.slane %v34_v17, 4 }
 0x25f   :  { %v656_v26 = vpack.c.bf16 %v632_v23, %v632_v23 }
 0x261   :  { %v666_v30 = vunpack.c.l.b16 %v656_v26 }
 0x264   :  { %v633_v24 = vpop.f32.mrf.mxu2 }
 0x265   :  { %v634_v25 = vadd.f32 %v633_v24, %v606_v22 }
 0x267   :  { %v2603_v27 = vpack.i.bf16 %v634_v25, %v632_v23  ;;  %v657_v29 = vpack.c.bf16 %v634_v25, %v634_v25  ;;  %v3106_v25 = vsel %vm792_vm9, %v794_v9, %v796_v20 }
 0x269   :  { %2604 = vrot.lane.b32.xlu0 %v2603_v27, %s2780_s20  ;;  %2594 = vrot.lane.b32.xlu2 %v2603_v27, %s2781_s21  ;;  %v667_v31 = vunpack.c.l.b16 %v657_v29 }
 0x26b   :  { %v3061_v32 = vpack.c.b16 %v667_v31, %v666_v30 }
 0x26d   :  { %669 = vrot.lane.b32.xlu1 %v3061_v32, %s2782_s22 }
 0x271   :  { %2599 = vrot.lane.b32.xlu2 %v2603_v27, %s2783_s23 }
 0x2c3   :  { %v2595_v33 = vpop.permute.xlu2 %2594 }
 0x2c4   :  { %v2597_v34 = vunpack.i.h.bf16 %v2595_v33  ;;  %v2596_v35 = vunpack.i.l.bf16 %v2595_v33 }
 0x2c6   :  { %v659_v37 = vpack.c.bf16 %v2597_v34, %v2597_v34  ;;  %v658_v38 = vpack.c.bf16 %v2596_v35, %v2596_v35 }
 0x2c8   :  { %v695_v39 = vunpack.c.l.b16 %v659_v37  ;;  %v694_v40 = vunpack.c.l.b16 %v658_v38 }
 0x2ca   :  { %v3066_v41 = vpack.c.b16 %v695_v39, %v694_v40 }
 0x2cb   :  { %v2600_v42 = vpop.permute.xlu2 %2599 }
 0x2cc   :  { %v2602_v43 = vunpack.i.h.bf16 %v2600_v42  ;;  %v2601_v44 = vunpack.i.l.bf16 %v2600_v42  ;;  %697 = vrot.lane.b32.xlu2 %v3066_v41, %s2782_s22 }
 0x2ce   :  { %v661_v45 = vpack.c.bf16 %v2602_v43, %v2602_v43  ;;  %v660_v46 = vpack.c.bf16 %v2601_v44, %v2601_v44 }
 0x2d0   :  { %v722_v47 = vunpack.c.l.b16 %v661_v45  ;;  %v721_v48 = vunpack.c.l.b16 %v660_v46 }
 0x2d2   :  { %v3070_v49 = vpack.c.b16 %v722_v47, %v721_v48 }
 0x2d4   :  { %724 = vrot.lane.b32.xlu2 %v3070_v49, %s2782_s22 }
 0x2db   :  { %v2605_v50 = vpop.permute.xlu0 %2604 }
 0x2dc   :  { %v2607_v51 = vunpack.i.h.bf16 %v2605_v50  ;;  %v2606_v52 = vunpack.i.l.bf16 %v2605_v50 }
 0x2de   :  { %v663_v53 = vpack.c.bf16 %v2607_v51, %v2607_v51  ;;  %v662_v54 = vpack.c.bf16 %v2606_v52, %v2606_v52 }
 0x2df   :  { %v670_v55 = vpop.permute.xlu1 %669 }
 0x2e0   :  { %v749_v56 = vunpack.c.l.b16 %v663_v53  ;;  %v748_v57 = vunpack.c.l.b16 %v662_v54  ;;  %v676_v58 = vsel %vm671_vm8, %v670_v55, 0 }
 0x2e1   :  { %685 = vmatpush.bf16.xpose.msrb.mxu3 %v676_v58 }
 0x2e2   :  { %v3075_v59 = vpack.c.b16 %v749_v56, %v748_v57 }
 0x2e4   :  { %751 = vrot.lane.b32.xlu2 %v3075_v59, %s2782_s22 }
 0x2e8   :  { %2347 = vmatmul.msk.bf16.vlgmr.msrb.gmra.mxu3 %vm671_vm8, %v3061_v32 }
 0x326   :  { %v698_v60 = vpop.permute.xlu2 %697 }
 0x327   :  { %v703_v61 = vsel %vm671_vm8, %v698_v60, 0 }
 0x328   :  { %712 = vmatpush.bf16.xpose.msra.mxu2 %v703_v61 }
 0x32e   :  { %v725_v62 = vpop.permute.xlu2 %724 }
 0x32f   :  { %v730_v63 = vsel %vm671_vm8, %v725_v62, 0  ;;  %2348 = vmatmul.msk.bf16.vlgmr.msra.gmra.mxu2 %vm671_vm8, %v3066_v41 }
 0x330   :  { %739 = vmatpush.bf16.xpose.msra.mxu3 %v730_v63 }
 0x337   :  { %2349 = vmatmul.msk.bf16.vlgmr.msra.gmra.mxu3 %vm671_vm8, %v3070_v49 }
 0x33e   :  { %v752_v0 = vpop.permute.xlu2 %751 }
 0x33f   :  { %v757_v1 = vsel %vm671_vm8, %v752_v0, 0 }
 0x340   :  { %766 = vmatpush.bf16.xpose.msrb.mxu2 %v757_v1 }
 0x347   :  { %2350 = vmatmul.msk.bf16.vlgmr.msrb.gmra.mxu2 %vm671_vm8, %v3075_v59 }
 0x36b   :  { %v687_v2 = vpop.f32.mrf.mxu3 }
 0x36c   :  { %v773_v48 = vmul.f32 1.442695, %v687_v2 }
 0x373   :  { %v689_v3 = vpop.f32.mrf.mxu3 }
 0x374   :  { %v775_v51 = vmul.f32 1.442695, %v689_v3 }
 0x3b2   :  { %v714_v4 = vpop.f32.mrf.mxu2 }
 0x3b3   :  { %v777_v5 = vmul.f32 1.442695, %v714_v4 }
 0x3b5   :  { %2660 = vpow2.f32 %v777_v5 }
 0x3ba   :  { %v716_v10 = vpop.f32.mrf.mxu2  ;;  %v741_v11 = vpop.f32.mrf.mxu3 }
 0x3bb   :  { %v2661_v12 = vpop.eup %2660  ;;  %v779_v13 = vmul.f32 1.442695, %v716_v10  ;;  %v781_v14 = vmul.f32 1.442695, %v741_v11 }
 0x3bc   :  { %v3098_v16 = vmul.f32 %v2661_v12, %v3095_v15 }
 0x3bd   :  { %2662 = vpow2.f32 %v779_v13 }
 0x3be   :  { %2664 = vpow2.f32 %v781_v14  ;;  %v815_v18 = vsel %vm808_vm10, %v3098_v16, 0.0 }
 0x3bf   :  { %816 = vadd.xlane.f32.xlu0 %v815_v18 }
 0x3c2   :  { %v743_v22 = vpop.f32.mrf.mxu3 }
 0x3c3   :  { %v2663_v23 = vpop.eup %2662  ;;  %v783_v24 = vmul.f32 1.442695, %v743_v22 }
 0x3c4   :  { %v2665_v26 = vpop.eup %2664  ;;  %v803_v27 = vmul.f32 %v2663_v23, %v3106_v25 }
 0x3c5   :  { %2666 = vpow2.f32 %v783_v24  ;;  %v804_v29 = vmul.f32 %v2665_v26, %v3095_v15 }
 0x3c6   :  { %v818_v30 = vsel %vm808_vm10, %v803_v27, 0.0 }
 0x3c7   :  { %819 = vadd.xlane.f32.xlu2 %v818_v30  ;;  %v821_v31 = vsel %vm808_vm10, %v804_v29, 0.0 }
 0x3c8   :  { %822 = vadd.xlane.f32.xlu1 %v821_v31 }
 0x3ca   :  { %v768_v33 = vpop.f32.mrf.mxu2 }
 0x3cb   :  { %v2667_v34 = vpop.eup %2666  ;;  %v785_v35 = vmul.f32 1.442695, %v768_v33 }
 0x3cc   :  { %v805_v37 = vmul.f32 %v2667_v34, %v3106_v25 }
 0x3cd   :  { %2668 = vpow2.f32 %v785_v35 }
 0x3ce   :  { %v824_v38 = vsel %vm808_vm10, %v805_v37, 0.0 }
 0x3cf   :  { %825 = vadd.xlane.f32.xlu0 %v824_v38 }
 0x3d2   :  { %v770_v39 = vpop.f32.mrf.mxu2 }
 0x3d3   :  { %v2669_v40 = vpop.eup %2668  ;;  %v787_v42 = vmul.f32 1.442695, %v770_v39 }
 0x3d4   :  { %v3115_v43 = vmul.f32 %v2669_v40, %v3095_v15 }
 0x3d5   :  { %2670 = vpow2.f32 %v787_v42 }
 0x3d6   :  { %v827_v44 = vsel %vm808_vm10, %v3115_v43, 0.0  ;;  %2672 = vpow2.f32 %v773_v48 }
 0x3d7   :  { %828 = vadd.xlane.f32.xlu2 %v827_v44  ;;  %2674 = vpow2.f32 %v775_v51 }
 0x3db   :  { %v2671_v45 = vpop.eup %2670 }
 0x3dc   :  { %v807_v46 = vmul.f32 %v2671_v45, %v3106_v25  ;;  %v2673_v50 = vpop.eup %2672 }
 0x3dd   :  { %v3130_v52 = vmul.f32 %v2673_v50, %v3095_v15  ;;  %v2675_v53 = vpop.eup %2674 }
 0x3de   :  { %v830_v47 = vsel %vm808_vm10, %v807_v46, 0.0 }
 0x3df   :  { %831 = vadd.xlane.f32.xlu1 %v830_v47 }
 0x3e3   :  { %887 = vrot.lane.b32.xlu0 %v3066_v41, %s2784_s28  ;;  %v809_v41 = vsel %vm808_vm10, %v3130_v52, 0.0 }
 0x3ef   :  { %912 = vrot.lane.b32.xlu2 %v3070_v49, %s2784_s28  ;;  %v801_v49 = vmul.f32 %v2675_v53, %v3106_v25 }
 0x3f1   :  { %v812_v54 = vsel %vm808_vm10, %v801_v49, 0.0 }
 0x3f8   :  { %937 = vrot.lane.b32.xlu1 %v3075_v59, %s2784_s28 }
 0x400   :  { %862 = vrot.lane.b32.xlu1 %v3061_v32, %s2784_s28 }
 0x40d   :  { %810 = vadd.xlane.f32.xlu0 %v809_v41 }
 0x418   :  { %813 = vadd.xlane.f32.xlu2 %v812_v54 }
 0x432   :  { %v817_v55 = vpop.xlane.xlu0 %816 }
 0x43a   :  { %v820_v57 = vpop.xlane.xlu2 %819 }
 0x43b   :  { %v823_v56 = vpop.xlane.xlu1 %822 }
 0x43c   :  { %2676 = vrcp.f32 %v823_v56  ;;  %v2359_v56 = vld [vmem:[%s3487_s2 + $0x24] sm:$0xf0] }
 0x43d   :  { %2678 = vrcp.f32 %v820_v57 }
 0x442   :  { %v826_v32 = vpop.xlane.xlu0 %825  ;;  %v2677_v58 = vpop.eup %2676 }
 0x443   :  { %2680 = vrcp.f32 %v826_v32  ;;  %v2679_v59 = vpop.eup %2678  ;;  %v845_v62 = vmul.f32 %v2677_v58, %v804_v29  ;;  %v2555_v32 = vld [vmem:[%s3487_s2 + $0x4] sm:$0xf]  ;;  %v2355_v58 = vld [vmem:[%s3487_s2 + $0xc] sm:$0xf0] }
 0x444   :  { %2682 = vrcp.f32 %v817_v55  ;;  %v844_v1 = vmul.f32 %v2679_v59, %v803_v27  ;;  %v2558_v55 = vld [vmem:[%s3487_s2 + $0x1c] sm:$0xf]  ;;  %v2358_v59 = vor.u32 %v2555_v32, %v2355_v58 }
 0x445   :  { %v853_v4 = vpack.c.bf16 %v845_v62, %v845_v62  ;;  %v2362_v57 = vor.u32 %v2558_v55, %v2359_v56 }
 0x446   :  { %v852_v5 = vpack.c.bf16 %v844_v1, %v844_v1 }
 0x447   :  { %v909_v9 = vunpack.c.l.b16 %v853_v4 }
 0x448   :  { %v885_v11 = vunpack.c.l.b16 %v852_v5 }
 0x449   :  { %v2681_v60 = vpop.eup %2680 }
 0x44a   :  { %v2683_v61 = vpop.eup %2682  ;;  %v846_v63 = vmul.f32 %v2681_v60, %v805_v37  ;;  %v829_v0 = vpop.xlane.xlu2 %828 }
 0x44b   :  { %v843_v3 = vmul.f32 %v2683_v61, %v3098_v16 }
 0x44c   :  { %v854_v2 = vpack.c.bf16 %v846_v63, %v846_v63 }
 0x44d   :  { %v851_v8 = vpack.c.bf16 %v843_v3, %v843_v3 }
 0x44e   :  { %v910_v7 = vunpack.c.l.b16 %v854_v2 }
 0x44f   :  { %v884_v14 = vunpack.c.l.b16 %v851_v8 }
 0x450   :  { %v911_v12 = vpack.c.b16 %v910_v7, %v909_v9 }
 0x451   :  { %v886_v18 = vpack.c.b16 %v885_v11, %v884_v14 }
 0x452   :  { %v913_v10 = vpop.permute.xlu2 %912  ;;  %v832_v13 = vpop.xlane.xlu1 %831 }
 0x453   :  { %925 = vmatpush.bf16.msrb.mxu3 %v913_v10  ;;  %2684 = vrcp.f32 %v832_v13 }
 0x454   :  { %2686 = vrcp.f32 %v829_v0 }
 0x455   :  { %v888_v17 = vpop.permute.xlu0 %887 }
 0x456   :  { %900 = vmatpush.bf16.msra.mxu2 %v888_v17  ;;  %2353 = vmatmul.msk.bf16.vlgmr.msrb.gmra.mxu3 %vm808_vm10, %v911_v12  ;;  %v1016_v17 = vperm.slane %v3048_v6, 2 }
 0x459   :  { %2352 = vmatmul.msk.bf16.vlgmr.msra.gmra.mxu2 %vm808_vm10, %v886_v18  ;;  %v2685_v16 = vpop.eup %2684 }
 0x45a   :  { %v2687_v20 = vpop.eup %2686  ;;  %v848_v22 = vmul.f32 %v2685_v16, %v807_v46 }
 0x45b   :  { %v847_v23 = vmul.f32 %v2687_v20, %v3115_v43 }
 0x45c   :  { %v856_v24 = vpack.c.bf16 %v848_v22, %v848_v22 }
 0x45d   :  { %v855_v26 = vpack.c.bf16 %v847_v23, %v847_v23 }
 0x45e   :  { %v935_v27 = vunpack.c.l.b16 %v856_v24 }
 0x45f   :  { %v934_v29 = vunpack.c.l.b16 %v855_v26 }
 0x461   :  { %v936_v31 = vpack.c.b16 %v935_v27, %v934_v29 }
 0x46a   :  { %v938_v30 = vpop.permute.xlu1 %937 }
 0x46b   :  { %950 = vmatpush.bf16.msra.mxu0 %v938_v30 }
 0x46e   :  { %2354 = vmatmul.msk.bf16.vlgmr.msra.gmra.mxu0 %vm808_vm10, %v936_v31 }
 0x472   :  { %v863_v33 = vpop.permute.xlu1 %862 }
 0x473   :  { %875 = vmatpush.bf16.msra.mxu1 %v863_v33 }
 0x477   :  { %1006 = vmatpush.bf16.msrb.mxu1 %v2362_v57 }
 0x47b   :  { %1007 = vmatpush.bf16.msrb.mxu1 %v2358_v59 }
 0x480   :  { %v811_v34 = vpop.xlane.xlu0 %810 }
 0x481   :  { %2688 = vrcp.f32 %v811_v34 }
 0x487   :  { %v2689_v37 = vpop.eup %2688 }
 0x488   :  { %v841_v38 = vmul.f32 %v2689_v37, %v3130_v52 }
 0x48a   :  { %v849_v40 = vpack.c.bf16 %v841_v38, %v841_v38 }
 0x48b   :  { %v814_v35 = vpop.xlane.xlu2 %813 }
 0x48c   :  { %2690 = vrcp.f32 %v814_v35  ;;  %v859_v44 = vunpack.c.l.b16 %v849_v40  ;;  %v2560_v40 = vld [vmem:[%s3487_s2 + $0x28] sm:$0xf0] }
 0x492   :  { %v2691_v39 = vpop.eup %2690 }
 0x493   :  { %v842_v42 = vmul.f32 %v2691_v39, %v801_v49  ;;  %v2370_v39 = vld [vmem:[%s3487_s2 + $0x20] sm:$0xf] }
 0x495   :  { %v850_v43 = vpack.c.bf16 %v842_v42, %v842_v42  ;;  %v2371_v42 = vor.u32 %v2560_v40, %v2370_v39  ;;  %v2564_v40 = vld [vmem:[%s3488_s3 + $0x18] sm:$0xff] }
 0x497   :  { %v860_v45 = vunpack.c.l.b16 %v850_v43  ;;  %1092 = vmatpush.bf16.msrb.mxu2 %v2371_v42 }
 0x499   :  { %v861_v46 = vpack.c.b16 %v860_v45, %v859_v44  ;;  %v2366_v45 = vld [vmem:[%s3487_s2 + $0x8] sm:$0xf] }
 0x49b   :  { %2351 = vmatmul.msk.bf16.vlgmr.msra.gmra.mxu1 %vm808_vm10, %v861_v46  ;;  %v2557_v46 = vld [vmem:[%s3487_s2 + $0x10] sm:$0xf0] }
 0x4d9   :  { %v927_v48 = vpop.f32.mrf.mxu3 }
 0x4dc   :  { %v902_v47 = vpop.f32.mrf.mxu2 }
 0x4e1   :  { %v929_v41 = vpop.f32.mrf.mxu3 }
 0x4e2   :  { %v2613_v54 = vpack.i.bf16 %v929_v41, %v927_v48  ;;  %v2367_v48 = vor.u32 %v2557_v46, %v2366_v45 }
 0x4e4   :  { %v904_v50 = vpop.f32.mrf.mxu2  ;;  %1093 = vmatpush.bf16.msrb.mxu2 %v2367_v48 }
 0x4e5   :  { %v2608_v51 = vpack.i.bf16 %v904_v50, %v902_v47 }
 0x4e7   :  { %2609 = vrot.lane.b32.xlu1 %v2608_v51, %s2785_s1 }
 0x4eb   :  { %v952_v53 = vpop.f32.mrf.mxu0 }
 0x4ef   :  { %2614 = vrot.lane.b32.xlu1 %v2613_v54, %s2786_s29 }
 0x4f3   :  { %v954_v52 = vpop.f32.mrf.mxu0 }
 0x4f4   :  { %v2618_v49 = vpack.i.bf16 %v954_v52, %v952_v53 }
 0x4f7   :  { %2619 = vrot.lane.b32.xlu1 %v2618_v49, %s2787_s30 }
 0x518   :  { %v877_v61 = vpop.f32.mrf.mxu1 }
 0x520   :  { %v879_v3 = vpop.f32.mrf.mxu1 }
 0x559   :  { %v2610_v60 = vpop.permute.xlu1 %2609 }
 0x55a   :  { %v2612_v63 = vunpack.i.h.bf16 %v2610_v60  ;;  %v2611_v0 = vunpack.i.l.bf16 %v2610_v60 }
 0x55c   :  { %v981_v5 = vsel %vm671_vm8, %v877_v61, %v2611_v0  ;;  %v982_v7 = vsel %vm671_vm8, %v879_v3, %v2612_v63 }
 0x561   :  { %v2615_v62 = vpop.permute.xlu1 %2614 }
 0x562   :  { %v2617_v1 = vunpack.i.h.bf16 %v2615_v62  ;;  %v2616_v2 = vunpack.i.l.bf16 %v2615_v62  ;;  %v1063_v62 = vperm.slane %v3048_v6, 3 }
 0x564   :  { %v983_v10 = vsel %vm808_vm10, %v981_v5, %v2616_v2  ;;  %v984_v11 = vsel %vm808_vm10, %v982_v7, %v2617_v1  ;;  %v1066_v2 = vperm.slane %v3048_v6, 4 }
 0x569   :  { %v2620_v4 = vpop.permute.xlu1 %2619 }
 0x56a   :  { %v2622_v8 = vunpack.i.h.bf16 %v2620_v4  ;;  %v2621_v9 = vunpack.i.l.bf16 %v2620_v4 }
 0x56c   :  { %v986_v12 = vsel %vm985_vm11, %v983_v10, %v2621_v9  ;;  %v987_v13 = vsel %vm985_vm11, %v984_v11, %v2622_v8  ;;  %v1070_v10 = vperm.slane %v3056_v19, 2 }
 0x56d   :  { %v988_v14 = vpack.c.bf16 %v987_v13, %v986_v12  ;;  %v2568_v13 = vld [vmem:[%s3488_s3 + $0x38] sm:$0xff] }
 0x56e   :  { %1253 = vmatpush.bf16.msra.mxu3 %v2568_v13 }
 0x56f   :  { %2363 = vmatmul.msk.bf16.vlgmr.msrb.gmra.mxu1 %vm547_vm0, %v988_v14 }
 0x5ec   :  { %v1009_v18 = vpop.f32.mrf.mxu1 }
 0x5ed   :  { %v1014_v16 = vadd.f32 %v1009_v18, %v3015_v21  ;;  %v2567_v18 = vld [vmem:[%s3488_s3 + $0x30] sm:$0xff] }
 0x5ee   :  { %1254 = vmatpush.bf16.msra.mxu3 %v2567_v18 }
 0x5ef   :  { %v3167_v20 = vadd.f32 %v1016_v17, %v1014_v16 }
 0x5f1   :  { %v1019_v22 = vsel %vm547_vm0, %v3167_v20, 0.0 }
 0x5f2   :  { %1020 = vadd.xlane.f32.xlu0 %v1019_v22 }
 0x5f4   :  { %v1011_v23 = vpop.f32.mrf.mxu1 }
 0x5f5   :  { %v1015_v24 = vadd.f32 %v1011_v23, %v3019_v28 }
 0x5f7   :  { %v3172_v26 = vadd.f32 %v1016_v17, %v1015_v24 }
 0x5f9   :  { %v1022_v27 = vsel %vm547_vm0, %v3172_v26, 0.0 }
 0x5fa   :  { %1023 = vadd.xlane.f32.xlu1 %v1022_v27 }
 0x665   :  { %v1021_v29 = vpop.xlane.xlu0 %1020 }
 0x666   :  { %v1025_v30 = vmul.f32 %v1021_v29, %v3023_v36  ;;  %v2566_v29 = vld [vmem:[%s3488_s3 + $0x28] sm:$0xff] }
 0x667   :  { %1255 = vmatpush.bf16.msra.mxu3 %v2566_v29 }
 0x668   :  { %v1027_v21 = vsub.f32 %v3167_v20, %v1025_v30 }
 0x66a   :  { %v1029_v31 = vmul.f32 %v1027_v21, %v1027_v21 }
 0x66c   :  { %v1031_v33 = vsel %vm547_vm0, %v1029_v31, 0.0 }
 0x66d   :  { %1032 = vadd.xlane.f32.xlu2 %v1031_v33  ;;  %v1024_v34 = vpop.xlane.xlu1 %1023 }
 0x66e   :  { %v1026_v35 = vmul.f32 %v1024_v34, %v3023_v36  ;;  %v2565_v34 = vld [vmem:[%s3488_s3 + $0x20] sm:$0xff] }
 0x66f   :  { %1256 = vmatpush.bf16.msra.mxu3 %v2565_v34 }
 0x670   :  { %v1028_v28 = vsub.f32 %v3172_v26, %v1026_v35 }
 0x672   :  { %v1030_v37 = vmul.f32 %v1028_v28, %v1028_v28 }
 0x673   :  { %1257 = vmatpush.bf16.msra.mxu3 %v2564_v40 }
 0x674   :  { %v1034_v38 = vsel %vm547_vm0, %v1030_v37, 0.0 }
 0x675   :  { %1035 = vadd.xlane.f32.xlu0 %v1034_v38 }
 0x6e0   :  { %v1033_v43 = vpop.xlane.xlu2 %1032 }
 0x6e1   :  { %v1037_v44 = vmul.f32 %v1033_v43, %v3023_v36 }
 0x6e3   :  { %v1039_v47 = vadd.f32 1e-06, %v1037_v44 }
 0x6e5   :  { %2692 = vrsqrt.f32 %v1039_v47  ;;  %vm1047_vm13 = vweird.f32 %v1039_v47 }
 0x6e8   :  { %v1036_v50 = vpop.xlane.xlu0 %1035 }
 0x6e9   :  { %v1038_v51 = vmul.f32 %v1036_v50, %v3023_v36  ;;  %v2563_v50 = vld [vmem:[%s3488_s3 + $0x10] sm:$0xff] }
 0x6ea   :  { %1258 = vmatpush.bf16.msra.mxu3 %v2563_v50 }
 0x6eb   :  { %v2693_v41 = vpop.eup %2692  ;;  %v1040_v53 = vadd.f32 1e-06, %v1038_v51 }
 0x6ec   :  { %v1042_v54 = vmul.f32 %v2693_v41, %v1039_v47  ;;  %vm1048_vm12 = vweird.f32 %v2693_v41 }
 0x6ed   :  { %2694 = vrsqrt.f32 %v1040_v53  ;;  %vm1049_vm14 = vmor %vm1047_vm13, %vm1048_vm12  ;;  %vm1057_vm1 = vweird.f32 %v1040_v53 }
 0x6ee   :  { %v1043_v52 = vmul.f32 %v2693_v41, %v1042_v54 }
 0x6f0   :  { %v1044_v49 = vmul.f32 0.5, %v1043_v52 }
 0x6f2   :  { %v1045_v55 = vsub.f32 1.5, %v1044_v49 }
 0x6f3   :  { %v2695_v56 = vpop.eup %2694 }
 0x6f4   :  { %v1046_v57 = vmul.f32 %v2693_v41, %v1045_v55  ;;  %v1052_v32 = vmul.f32 %v2695_v56, %v1040_v53  ;;  %vm1058_vm15 = vweird.f32 %v2695_v56 }
 0x6f5   :  { %vm1059_vm2 = vmor %vm1057_vm1, %vm1058_vm15 }
 0x6f6   :  { %v1053_v58 = vmul.f32 %v2695_v56, %v1052_v32  ;;  %v1050_v59 = vsel %vm1049_vm14, %v2693_v41, %v1046_v57 }
 0x6f7   :  { %v1061_v63 = vmul.f32 %v1050_v59, %v1027_v21 }
 0x6f8   :  { %v1054_v60 = vmul.f32 0.5, %v1053_v58 }
 0x6f9   :  { %v1064_v3 = vmul.f32 %v1063_v62, %v1061_v63 }
 0x6fa   :  { %v1055_v61 = vsub.f32 1.5, %v1054_v60 }
 0x6fb   :  { %v1067_v7 = vadd.f32 %v1066_v2, %v1064_v3 }
 0x6fc   :  { %v1056_v0 = vmul.f32 %v2695_v56, %v1055_v61  ;;  %v2561_v61 = vld [vmem:[%s3488_s3] sm:$0xff] }
 0x6fe   :  { %v1060_v1 = vsel %vm1059_vm2, %v2695_v56, %v1056_v0  ;;  %v2562_v56 = vld [vmem:[%s3488_s3 + $0x8] sm:$0xff] }
 0x6ff   :  { %v1062_v4 = vmul.f32 %v1060_v1, %v1028_v28  ;;  %1259 = vmatpush.bf16.msra.mxu3 %v2562_v56 }
 0x701   :  { %v1065_v5 = vmul.f32 %v1063_v62, %v1062_v4 }
 0x703   :  { %v1068_v8 = vadd.f32 %v1066_v2, %v1065_v5  ;;  %1260 = vmatpush.bf16.msra.mxu3 %v2561_v61 }
 0x705   :  { %v1069_v9 = vpack.c.bf16 %v1068_v8, %v1067_v7 }
 0x707   :  { %2372 = vmatmul.msk.bf16.vlgmr.msrb.gmra.mxu2 %vm547_vm0, %v1069_v9 }
 0x78a   :  { %v1095_v11 = vpop.f32.mrf.mxu2 }
 0x78b   :  { %v3200_v12 = vadd.f32 %v1095_v11, %v1070_v10 }
 0x78d   :  { %v3206_v14 = vmul.f32 0.70710677, %v3200_v12 }
 0x78f   :  { %v1104_v17 = vmul.f32 %v3206_v14, %v3206_v14 }
 0x791   :  { %v1105_v16 = vmin.f32 %v1104_v17, 16.0 }
 0x792   :  { %v1097_v22 = vpop.f32.mrf.mxu2 }
 0x793   :  { %v1106_v23 = vmul.f32 2.1237322e-06, %v1105_v16  ;;  %v1117_v24 = vmul.f32 3.8918573e-05, %v1105_v16  ;;  %v3213_v27 = vadd.f32 %v1097_v22, %v1070_v10 }
 0x795   :  { %v1107_v30 = vadd.f32 0.00028619796, %v1106_v23  ;;  %v1118_v21 = vadd.f32 0.001143296, %v1117_v24  ;;  %v3219_v31 = vmul.f32 0.70710677, %v3213_v27 }
 0x797   :  { %v1119_v33 = vmul.f32 %v1118_v21, %v1105_v16  ;;  %v1144_v35 = vmul.f32 %v3219_v31, %v3219_v31  ;;  %v1108_v28 = vmul.f32 %v1107_v30, %v1105_v16 }
 0x799   :  { %v1120_v37 = vadd.f32 0.014752088, %v1119_v33  ;;  %v1145_v38 = vmin.f32 %v1144_v35, 16.0  ;;  %v1109_v44 = vadd.f32 0.0036580483, %v1108_v28 }
 0x79b   :  { %v1121_v39 = vmul.f32 %v1120_v37, %v1105_v16  ;;  %v1146_v42 = vmul.f32 2.1237322e-06, %v1145_v38  ;;  %v1157_v43 = vmul.f32 3.8918573e-05, %v1145_v38  ;;  %v1110_v53 = vmul.f32 %v1109_v44, %v1105_v16 }
 0x79d   :  { %v1122_v45 = vadd.f32 0.112945676, %v1121_v39  ;;  %v1147_v46 = vadd.f32 0.00028619796, %v1146_v42  ;;  %v1158_v47 = vadd.f32 0.001143296, %v1157_v43 }
 0x79e   :  { %v1111_v32 = vadd.f32 0.05243302, %v1110_v53 }
 0x79f   :  { %v1123_v48 = vmul.f32 %v1122_v45, %v1105_v16  ;;  %v1148_v51 = vmul.f32 %v1147_v46, %v1145_v38  ;;  %v1159_v41 = vmul.f32 %v1158_v47, %v1145_v38 }
 0x7a0   :  { %v1112_v63 = vmul.f32 %v1111_v32, %v1105_v16 }
 0x7a1   :  { %v1124_v54 = vadd.f32 0.4994258, %v1123_v48  ;;  %v1149_v52 = vadd.f32 0.0036580483, %v1148_v51  ;;  %v1160_v49 = vadd.f32 0.014752088, %v1159_v41 }
 0x7a2   :  { %v1113_v4 = vadd.f32 0.18741608, %v1112_v63  ;;  %v1100_v51 = vmul.f32 0.5, %v3200_v12  ;;  %v1101_v41 = vmul.f32 0.5, %v3213_v27 }
 0x7a3   :  { %v1125_v55 = vmul.f32 %v1124_v54, %v1105_v16  ;;  %v1161_v57 = vmul.f32 %v1160_v49, %v1145_v38  ;;  %v1150_v59 = vmul.f32 %v1149_v52, %v1145_v38 }
 0x7a4   :  { %v1114_v10 = vmul.f32 %v1113_v4, %v1105_v16  ;;  %v2421_v4 = vld [vmem:[%s3487_s2 + $0x48] sm:$0xf] }
 0x7a5   :  { %v1126_v58 = vadd.f32 1.0, %v1125_v55  ;;  %v1162_v60 = vadd.f32 0.112945676, %v1161_v57  ;;  %v1151_v0 = vadd.f32 0.05243302, %v1150_v59  ;;  %v1269_v55 = vperm.slane %v3048_v6, 5 }
 0x7a6   :  { %v1115_v23 = vadd.f32 1.1283791, %v1114_v10  ;;  %v2417_v10 = vld [vmem:[%s3487_s2 + $0x30] sm:$0xf] }
 0x7a7   :  { %2696 = vrcp.f32 %v1126_v58  ;;  %v1163_v62 = vmul.f32 %v1162_v60, %v1145_v38  ;;  %v1152_v7 = vmul.f32 %v1151_v0, %v1145_v38  ;;  %v1138_v13 = vand.u32 2147483648, %v1126_v58 }
 0x7a8   :  { %v1136_v18 = vand.u32 2147483647, %v1126_v58  ;;  %vm1132_vm4 = vweird.f32 %v1126_v58  ;;  %v1116_v35 = vmul.f32 %v1115_v23, %v3206_v14 }
 0x7a9   :  { %v1164_v1 = vadd.f32 0.4994258, %v1163_v62  ;;  %v1153_v17 = vadd.f32 0.18741608, %v1152_v7  ;;  %v1139_v30 = vor.u32 1.1754944e-38, %v1138_v13 }
 0x7aa   :  { %vm1137_vm6 = vcmp.eq.f32.partialorder %v1136_v18, 8.507059e+37 }
 0x7ab   :  { %v1165_v2 = vmul.f32 %v1164_v1, %v1145_v38  ;;  %v1154_v21 = vmul.f32 %v1153_v17, %v1145_v38 }
 0x7ad   :  { %v2697_v3 = vpop.eup %2696  ;;  %v1166_v8 = vadd.f32 1.0, %v1165_v2  ;;  %v1155_v16 = vadd.f32 1.1283791, %v1154_v21 }
 0x7ae   :  { %v1128_v5 = vmul.f32 %v2697_v3, %v1126_v58  ;;  %vm1133_vm3 = vweird.f32 %v2697_v3 }
 0x7af   :  { %2698 = vrcp.f32 %v1166_v8  ;;  %vm1134_vm5 = vmor %vm1132_vm4, %vm1133_vm3  ;;  %v1178_v37 = vand.u32 2147483648, %v1166_v8  ;;  %v1176_v42 = vand.u32 2147483647, %v1166_v8  ;;  %vm1172_vm9 = vweird.f32 %v1166_v8 }
 0x7b0   :  { %v1129_v9 = vsub.f32 1.0, %v1128_v5  ;;  %v1156_v46 = vmul.f32 %v1155_v16, %v3219_v31  ;;  %v2573_v5 = vld [vmem:[%s3487_s2 + $0x50] sm:$0xf0] }
 0x7b1   :  { %v1179_v44 = vor.u32 1.1754944e-38, %v1178_v37  ;;  %vm1177_vm13 = vcmp.eq.f32.partialorder %v1176_v42, 8.507059e+37  ;;  %v2422_v7 = vor.u32 %v2573_v5, %v2421_v4  ;;  %v1325_v42 = vperm.slane %v3048_v6, 6 }
 0x7b2   :  { %v1130_v11 = vmul.f32 %v2697_v3, %v1129_v9 }
 0x7b3   :  { %1354 = vmatpush.bf16.msrb.mxu0 %v2422_v7 }
 0x7b4   :  { %v1131_v22 = vadd.f32 %v2697_v3, %v1130_v11  ;;  %v2570_v11 = vld [vmem:[%s3487_s2 + $0x38] sm:$0xf0] }
 0x7b5   :  { %v2699_v24 = vpop.eup %2698  ;;  %v2418_v17 = vor.u32 %v2570_v11, %v2417_v10 }
 0x7b6   :  { %v1135_v29 = vsel %vm1134_vm5, %v2697_v3, %v1131_v22  ;;  %v1168_v33 = vmul.f32 %v2699_v24, %v1166_v8  ;;  %vm1173_vm7 = vweird.f32 %v2699_v24 }
 0x7b7   :  { %v1140_v34 = vsel %vm1137_vm6, %v1139_v30, %v1135_v29  ;;  %vm1174_vm12 = vmor %vm1172_vm9, %vm1173_vm7  ;;  %1355 = vmatpush.bf16.msrb.mxu0 %v2418_v17 }
 0x7b8   :  { %v1169_v28 = vsub.f32 1.0, %v1168_v33  ;;  %v1141_v39 = vmul.f32 %v1140_v34, %v1116_v35 }
 0x7ba   :  { %v1170_v40 = vmul.f32 %v2699_v24, %v1169_v28  ;;  %v2373_v45 = vclamps-f32 %v1141_v39, 1.0 }
 0x7bc   :  { %v1171_v43 = vadd.f32 %v2699_v24, %v1170_v40  ;;  %v1184_v50 = vadd.f32 1.0, %v2373_v45 }
 0x7be   :  { %v1175_v38 = vsel %vm1174_vm12, %v2699_v24, %v1171_v43  ;;  %v1186_v54 = vmul.f32 %v1184_v50, %v1100_v51 }
 0x7bf   :  { %v1180_v47 = vsel %vm1177_vm13, %v1179_v44, %v1175_v38 }
 0x7c0   :  { %v1181_v48 = vmul.f32 %v1180_v47, %v1156_v46  ;;  %v1328_v46 = vperm.slane %v3048_v6, 7 }
 0x7c2   :  { %v2374_v14 = vclamps-f32 %v1181_v48, 1.0 }
 0x7c4   :  { %v1185_v53 = vadd.f32 1.0, %v2374_v14 }
 0x7c6   :  { %v1187_v52 = vmul.f32 %v1185_v53, %v1101_v41  ;;  %v1332_v53 = vperm.slane %v3056_v19, 1 }
 0x7c8   :  { %v1188_v49 = vpack.c.bf16 %v1187_v52, %v1186_v54 }
 0x7ca   :  { %1261 = vmatmul.bf16.vlgmr.msra.gmra.mxu3 %v1188_v49 }
 0x84d   :  { %v1262_v56 = vpop.f32.mrf.mxu3 }
 0x84e   :  { %v1267_v31 = vadd.f32 %v1262_v56, %v3167_v20 }
 0x850   :  { %v3244_v57 = vadd.f32 %v1269_v55, %v1267_v31 }
 0x852   :  { %v1281_v32 = vsel %vm547_vm0, %v3244_v57, 0.0 }
 0x853   :  { %1282 = vadd.xlane.f32.xlu2 %v1281_v32 }
 0x855   :  { %v1264_v58 = vpop.f32.mrf.mxu3 }
 0x856   :  { %v1268_v12 = vadd.f32 %v1264_v58, %v3172_v26 }
 0x858   :  { %v3249_v27 = vadd.f32 %v1269_v55, %v1268_v12 }
 0x85a   :  { %v1284_v59 = vsel %vm547_vm0, %v3249_v27, 0.0 }
 0x85b   :  { %1285 = vadd.xlane.f32.xlu0 %v1284_v59 }
 0x8c6   :  { %v1283_v60 = vpop.xlane.xlu2 %1282 }
 0x8c7   :  { %v1287_v61 = vmul.f32 %v1283_v60, %v3023_v36 }
 0x8c9   :  { %v1289_v20 = vsub.f32 %v3244_v57, %v1287_v61 }
 0x8cb   :  { %v1291_v62 = vmul.f32 %v1289_v20, %v1289_v20 }
 0x8cd   :  { %v1293_v63 = vsel %vm547_vm0, %v1291_v62, 0.0 }
 0x8ce   :  { %1294 = vadd.xlane.f32.xlu2 %v1293_v63  ;;  %v1286_v0 = vpop.xlane.xlu0 %1285 }
 0x8cf   :  { %v1288_v1 = vmul.f32 %v1286_v0, %v3023_v36 }
 0x8d1   :  { %v1290_v26 = vsub.f32 %v3249_v27, %v1288_v1 }
 0x8d3   :  { %v1292_v2 = vmul.f32 %v1290_v26, %v1290_v26 }
 0x8d5   :  { %v1296_v3 = vsel %vm547_vm0, %v1292_v2, 0.0 }
 0x8d6   :  { %1297 = vadd.xlane.f32.xlu0 %v1296_v3 }
 0x941   :  { %v1295_v8 = vpop.xlane.xlu2 %1294 }
 0x942   :  { %v1299_v9 = vmul.f32 %v1295_v8, %v3023_v36 }
 0x944   :  { %v1301_v13 = vadd.f32 1e-06, %v1299_v9 }
 0x946   :  { %2700 = vrsqrt.f32 %v1301_v13  ;;  %vm1309_vm15 = vweird.f32 %v1301_v13 }
 0x949   :  { %v1298_v18 = vpop.xlane.xlu0 %1297 }
 0x94a   :  { %v1300_v22 = vmul.f32 %v1298_v18, %v3023_v36 }
 0x94c   :  { %v2701_v23 = vpop.eup %2700  ;;  %v1302_v24 = vadd.f32 1e-06, %v1300_v22 }
 0x94d   :  { %v1304_v29 = vmul.f32 %v2701_v23, %v1301_v13  ;;  %vm1310_vm14 = vweird.f32 %v2701_v23 }
 0x94e   :  { %2702 = vrsqrt.f32 %v1302_v24  ;;  %vm1311_vm1 = vmor %vm1309_vm15, %vm1310_vm14  ;;  %vm1319_vm3 = vweird.f32 %v1302_v24 }
 0x94f   :  { %v1305_v30 = vmul.f32 %v2701_v23, %v1304_v29 }
 0x951   :  { %v1306_v21 = vmul.f32 0.5, %v1305_v30 }
 0x953   :  { %v1307_v33 = vsub.f32 1.5, %v1306_v21 }
 0x954   :  { %v2703_v34 = vpop.eup %2702 }
 0x955   :  { %v1308_v35 = vmul.f32 %v2701_v23, %v1307_v33  ;;  %v1314_v28 = vmul.f32 %v2703_v34, %v1302_v24  ;;  %vm1320_vm2 = vweird.f32 %v2703_v34 }
 0x956   :  { %vm1321_vm4 = vmor %vm1319_vm3, %vm1320_vm2 }
 0x957   :  { %v1315_v16 = vmul.f32 %v2703_v34, %v1314_v28  ;;  %v1312_v37 = vsel %vm1311_vm1, %v2701_v23, %v1308_v35 }
 0x958   :  { %v1323_v43 = vmul.f32 %v1312_v37, %v1289_v20 }
 0x959   :  { %v1316_v39 = vmul.f32 0.5, %v1315_v16 }
 0x95a   :  { %v1326_v38 = vmul.f32 %v1325_v42, %v1323_v43 }
 0x95b   :  { %v1317_v40 = vsub.f32 1.5, %v1316_v39 }
 0x95c   :  { %v1329_v50 = vadd.f32 %v1328_v46, %v1326_v38 }
 0x95d   :  { %v1318_v44 = vmul.f32 %v2703_v34, %v1317_v40 }
 0x95f   :  { %v1322_v45 = vsel %vm1321_vm4, %v2703_v34, %v1318_v44  ;;  %vm1988_vm4 = vcmask 1040384  }
 0x960   :  { %v1324_v47 = vmul.f32 %v1322_v45, %v1290_v26 }
 0x962   :  { %v1327_v48 = vmul.f32 %v1325_v42, %v1324_v47 }
 0x964   :  { %v1330_v14 = vadd.f32 %v1328_v46, %v1327_v48 }
 0x966   :  { %v1331_v51 = vpack.c.bf16 %v1330_v14, %v1329_v50 }
 0x968   :  { %2423 = vmatmul.msk.bf16.vlgmr.msrb.gmra.mxu0 %vm547_vm0, %v1331_v51 }
 0x9e5   :  { %v1357_v41 = vpop.f32.mrf.mxu0 }
 0x9e6   :  { %v1358_v52 = vadd.f32 %v1357_v41, %v1332_v53 }
 0x9e8   :  { %v1382_v6 = vpack.c.bf16 %v1358_v52, %v1358_v52 }
 0x9ea   :  { %v1392_v32 = vunpack.c.l.b16 %v1382_v6 }
 0x9ed   :  { %v1359_v54 = vpop.f32.mrf.mxu0 }
 0x9ee   :  { %v1360_v49 = vadd.f32 %v1359_v54, %v1332_v53 }
 0x9f0   :  { %v2633_v55 = vpack.i.bf16 %v1360_v49, %v1358_v52  ;;  %v1383_v56 = vpack.c.bf16 %v1360_v49, %v1360_v49 }
 0x9f2   :  { %2634 = vrot.lane.b32.xlu1 %v2633_v55, %s2780_s20  ;;  %2629 = vrot.lane.b32.xlu0 %v2633_v55, %s2783_s23  ;;  %v1393_v31 = vunpack.c.l.b16 %v1383_v56 }
 0x9f3   :  { %2624 = vrot.lane.b32.xlu2 %v2633_v55, %s2781_s21 }
 0x9f4   :  { %v3280_v58 = vpack.c.b16 %v1393_v31, %v1392_v32 }
 0x9fa   :  { %1395 = vrot.lane.b32.xlu0 %v3280_v58, %s2782_s22 }
 0xa4d   :  { %v2625_v19 = vpop.permute.xlu2 %2624 }
 0xa4e   :  { %v2627_v12 = vunpack.i.h.bf16 %v2625_v19  ;;  %v2626_v59 = vunpack.i.l.bf16 %v2625_v19 }
 0xa50   :  { %v1385_v60 = vpack.c.bf16 %v2627_v12, %v2627_v12  ;;  %v1384_v61 = vpack.c.bf16 %v2626_v59, %v2626_v59 }
 0xa52   :  { %v1420_v20 = vunpack.c.l.b16 %v1385_v60  ;;  %v1419_v62 = vunpack.c.l.b16 %v1384_v61 }
 0xa54   :  { %v3284_v63 = vpack.c.b16 %v1420_v20, %v1419_v62 }
 0xa56   :  { %1422 = vrot.lane.b32.xlu2 %v3284_v63, %s2782_s22 }
 0xa64   :  { %v2635_v0 = vpop.permute.xlu1 %2634  ;;  %v2630_v1 = vpop.permute.xlu0 %2629 }
 0xa65   :  { %v2637_v26 = vunpack.i.h.bf16 %v2635_v0  ;;  %v2636_v2 = vunpack.i.l.bf16 %v2635_v0  ;;  %v2632_v3 = vunpack.i.h.bf16 %v2630_v1  ;;  %v2631_v4 = vunpack.i.l.bf16 %v2630_v1 }
 0xa67   :  { %v1389_v5 = vpack.c.bf16 %v2637_v26, %v2637_v26  ;;  %v1388_v7 = vpack.c.bf16 %v2636_v2, %v2636_v2  ;;  %v1387_v8 = vpack.c.bf16 %v2632_v3, %v2632_v3  ;;  %v1386_v9 = vpack.c.bf16 %v2631_v4, %v2631_v4 }
 0xa69   :  { %v1474_v10 = vunpack.c.l.b16 %v1389_v5  ;;  %v1473_v11 = vunpack.c.l.b16 %v1388_v7  ;;  %v1447_v13 = vunpack.c.l.b16 %v1387_v8  ;;  %v1446_v17 = vunpack.c.l.b16 %v1386_v9 }
 0xa6b   :  { %v3288_v18 = vpack.c.b16 %v1474_v10, %v1473_v11  ;;  %v1448_v22 = vpack.c.b16 %v1447_v13, %v1446_v17 }
 0xa6c   :  { %v1396_v23 = vpop.permute.xlu0 %1395 }
 0xa6d   :  { %v1401_v24 = vsel %vm671_vm8, %v1396_v23, 0  ;;  %1476 = vrot.lane.b32.xlu2 %v3288_v18, %s2782_s22  ;;  %1449 = vrot.lane.b32.xlu0 %v1448_v22, %s2782_s22 }
 0xa6e   :  { %1410 = vmatpush.bf16.xpose.msra.mxu1 %v1401_v24 }
 0xa75   :  { %2424 = vmatmul.msk.bf16.vlgmr.msra.gmra.mxu1 %vm671_vm8, %v3280_v58 }
 0xab0   :  { %v1423_v29 = vpop.permute.xlu2 %1422 }
 0xab1   :  { %v1428_v30 = vsel %vm671_vm8, %v1423_v29, 0 }
 0xab2   :  { %1437 = vmatpush.bf16.xpose.msra.mxu2 %v1428_v30 }
 0xab9   :  { %2425 = vmatmul.msk.bf16.vlgmr.msra.gmra.mxu2 %vm671_vm8, %v3284_v63 }
 0xac7   :  { %v1477_v21 = vpop.permute.xlu2 %1476 }
 0xac8   :  { %v1482_v33 = vsel %vm671_vm8, %v1477_v21, 0 }
 0xac9   :  { %1491 = vmatpush.bf16.xpose.msrb.mxu1 %v1482_v33 }
 0xad0   :  { %2427 = vmatmul.msk.bf16.vlgmr.msrb.gmra.mxu1 %vm671_vm8, %v3288_v18 }
 0xadf   :  { %v1450_v34 = vpop.permute.xlu0 %1449 }
 0xae0   :  { %v1455_v35 = vsel %vm671_vm8, %v1450_v34, 0 }
 0xae1   :  { %1464 = vmatpush.bf16.xpose.msra.mxu0 %v1455_v35 }
 0xae8   :  { %2426 = vmatmul.msk.bf16.vlgmr.msra.gmra.mxu0 %vm671_vm8, %v1448_v22 }
 0xaf2   :  { %v1412_v28 = vpop.f32.mrf.mxu1 }
 0xaf3   :  { %v1498_v62 = vmul.f32 1.442695, %v1412_v28 }
 0xafa   :  { %v1414_v40 = vpop.f32.mrf.mxu1 }
 0xafb   :  { %v1500_v2 = vmul.f32 1.442695, %v1414_v40 }
 0xb3c   :  { %v1439_v16 = vpop.f32.mrf.mxu2 }
 0xb3d   :  { %v1502_v37 = vmul.f32 1.442695, %v1439_v16 }
 0xb3f   :  { %2704 = vpow2.f32 %v1502_v37 }
 0xb44   :  { %v1441_v44 = vpop.f32.mrf.mxu2 }
 0xb45   :  { %v2705_v39 = vpop.eup %2704  ;;  %v1504_v38 = vmul.f32 1.442695, %v1441_v44 }
 0xb46   :  { %v3305_v42 = vmul.f32 %v2705_v39, %v3095_v15 }
 0xb48   :  { %v1528_v43 = vsel %vm808_vm10, %v3305_v42, 0.0 }
 0xb49   :  { %1529 = vadd.xlane.f32.xlu1 %v1528_v43 }
 0xb4d   :  { %v1493_v45 = vpop.f32.mrf.mxu1 }
 0xb4e   :  { %v1510_v46 = vmul.f32 1.442695, %v1493_v45 }
 0xb50   :  { %2706 = vpow2.f32 %v1510_v46 }
 0xb51   :  { %2708 = vpow2.f32 %v1504_v38 }
 0xb55   :  { %v1495_v53 = vpop.f32.mrf.mxu1 }
 0xb56   :  { %v2707_v47 = vpop.eup %2706  ;;  %v1512_v49 = vmul.f32 1.442695, %v1495_v53 }
 0xb57   :  { %v1520_v48 = vmul.f32 %v2707_v47, %v3095_v15  ;;  %v2709_v14 = vpop.eup %2708 }
 0xb58   :  { %v3312_v51 = vmul.f32 %v2709_v14, %v3106_v25 }
 0xb59   :  { %v1540_v50 = vsel %vm808_vm10, %v1520_v48, 0.0 }
 0xb5a   :  { %1541 = vadd.xlane.f32.xlu0 %v1540_v50  ;;  %v1531_v41 = vsel %vm808_vm10, %v3312_v51, 0.0 }
 0xb62   :  { %1532 = vadd.xlane.f32.xlu0 %v1531_v41 }
 0xb65   :  { %v1466_v54 = vpop.f32.mrf.mxu0 }
 0xb66   :  { %v1506_v52 = vmul.f32 1.442695, %v1466_v54 }
 0xb68   :  { %2710 = vpow2.f32 %v1506_v52 }
 0xb69   :  { %2712 = vpow2.f32 %v1512_v49 }
 0xb6d   :  { %v1468_v55 = vpop.f32.mrf.mxu0 }
 0xb6e   :  { %v2711_v56 = vpop.eup %2710  ;;  %v1508_v6 = vmul.f32 1.442695, %v1468_v55 }
 0xb6f   :  { %v1518_v31 = vmul.f32 %v2711_v56, %v3095_v15  ;;  %v2713_v19 = vpop.eup %2712 }
 0xb70   :  { %2714 = vpow2.f32 %v1508_v6  ;;  %v1521_v12 = vmul.f32 %v2713_v19, %v3106_v25 }
 0xb71   :  { %v1534_v32 = vsel %vm808_vm10, %v1518_v31, 0.0  ;;  %2716 = vpow2.f32 %v1498_v62 }
 0xb72   :  { %1535 = vadd.xlane.f32.xlu2 %v1534_v32  ;;  %v1543_v61 = vsel %vm808_vm10, %v1521_v12, 0.0  ;;  %2718 = vpow2.f32 %v1500_v2  ;;  %v2572_v2 = vld [vmem:[%s3487_s2 + $0x4c] sm:$0xf] }
 0xb76   :  { %v2715_v59 = vpop.eup %2714  ;;  %1625 = vrot.lane.b32.xlu0 %v1448_v22, %s2784_s28 }
 0xb77   :  { %v1519_v60 = vmul.f32 %v2715_v59, %v3106_v25  ;;  %v2717_v0 = vpop.eup %2716 }
 0xb78   :  { %v3330_v1 = vmul.f32 %v2717_v0, %v3095_v15  ;;  %v2719_v3 = vpop.eup %2718 }
 0xb79   :  { %v1537_v20 = vsel %vm808_vm10, %v1519_v60, 0.0  ;;  %v1515_v4 = vmul.f32 %v2719_v3, %v3106_v25  ;;  %v2436_v3 = vld [vmem:[%s3487_s2 + $0x54] sm:$0xf0] }
 0xb7a   :  { %1544 = vadd.xlane.f32.xlu2 %v1543_v61  ;;  %1538 = vadd.xlane.f32.xlu1 %v1537_v20  ;;  %v1522_v26 = vsel %vm808_vm10, %v3330_v1, 0.0 }
 0xb7b   :  { %v1525_v5 = vsel %vm808_vm10, %v1515_v4, 0.0 }
 0xb92   :  { %1650 = vrot.lane.b32.xlu2 %v3288_v18, %s2784_s28 }
 0xb93   :  { %1600 = vrot.lane.b32.xlu1 %v3284_v63, %s2784_s28 }
 0xb9a   :  { %1575 = vrot.lane.b32.xlu2 %v3280_v58, %s2784_s28 }
 0xba0   :  { %1523 = vadd.xlane.f32.xlu0 %v1522_v26 }
 0xbbc   :  { %v1530_v8 = vpop.xlane.xlu1 %1529 }
 0xbbd   :  { %1526 = vadd.xlane.f32.xlu1 %v1525_v5  ;;  %v2569_v5 = vld [vmem:[%s3487_s2 + $0x34] sm:$0xf] }
 0xbcd   :  { %v1542_v63 = vpop.xlane.xlu0 %1541 }
 0xbce   :  { %2720 = vrcp.f32 %v1542_v63  ;;  %v2432_v63 = vld [vmem:[%s3487_s2 + $0x3c] sm:$0xf0] }
 0xbd4   :  { %v2721_v11 = vpop.eup %2720 }
 0xbd5   :  { %v1533_v7 = vpop.xlane.xlu0 %1532  ;;  %v1560_v17 = vmul.f32 %v2721_v11, %v1520_v48 }
 0xbd7   :  { %v1568_v23 = vpack.c.bf16 %v1560_v17, %v1560_v17 }
 0xbd9   :  { %v1647_v28 = vunpack.c.l.b16 %v1568_v23 }
 0xbe5   :  { %v1536_v9 = vpop.xlane.xlu2 %1535 }
 0xbe6   :  { %2722 = vrcp.f32 %v1536_v9 }
 0xbe8   :  { %v1626_v58 = vpop.permute.xlu0 %1625 }
 0xbe9   :  { %1638 = vmatpush.bf16.msrb.mxu0 %v1626_v58 }
 0xbec   :  { %v2723_v13 = vpop.eup %2722 }
 0xbed   :  { %v1545_v15 = vpop.xlane.xlu2 %1544  ;;  %v1539_v10 = vpop.xlane.xlu1 %1538  ;;  %v1558_v25 = vmul.f32 %v2723_v13, %v1518_v31 }
 0xbee   :  { %2724 = vrcp.f32 %v1545_v15 }
 0xbef   :  { %2726 = vrcp.f32 %v1539_v10  ;;  %v1566_v30 = vpack.c.bf16 %v1558_v25, %v1558_v25 }
 0xbf0   :  { %2728 = vrcp.f32 %v1533_v7  ;;  %v2435_v7 = vor.u32 %v2569_v5, %v2432_v63 }
 0xbf1   :  { %2730 = vrcp.f32 %v1530_v8  ;;  %v1622_v39 = vunpack.c.l.b16 %v1566_v30 }
 0xbf4   :  { %v2725_v18 = vpop.eup %2724 }
 0xbf5   :  { %v2727_v22 = vpop.eup %2726  ;;  %v1561_v24 = vmul.f32 %v2725_v18, %v1521_v12  ;;  %v1651_v29 = vpop.permute.xlu2 %1650 }
 0xbf6   :  { %v1559_v21 = vmul.f32 %v2727_v22, %v1519_v60  ;;  %1663 = vmatpush.bf16.msra.mxu1 %v1651_v29  ;;  %v2729_v34 = vpop.eup %2728 }
 0xbf7   :  { %v1569_v33 = vpack.c.bf16 %v1561_v24, %v1561_v24  ;;  %v2731_v37 = vpop.eup %2730  ;;  %v1557_v43 = vmul.f32 %v2729_v34, %v3312_v51 }
 0xbf8   :  { %v1567_v35 = vpack.c.bf16 %v1559_v21, %v1559_v21  ;;  %v1556_v46 = vmul.f32 %v2731_v37, %v3305_v42 }
 0xbf9   :  { %v1648_v16 = vunpack.c.l.b16 %v1569_v33  ;;  %v1565_v47 = vpack.c.bf16 %v1557_v43, %v1557_v43 }
 0xbfa   :  { %v1623_v40 = vunpack.c.l.b16 %v1567_v35  ;;  %v1564_v48 = vpack.c.bf16 %v1556_v46, %v1556_v46  ;;  %v3368_v35 = vld [vmem:[%s3489_s4 + $0x18] sm:$0xff] }
 0xbfb   :  { %v1649_v44 = vpack.c.b16 %v1648_v16, %v1647_v28  ;;  %v1598_v50 = vunpack.c.l.b16 %v1565_v47  ;;  %v1728_v28 = vperm.slane %v3368_v35, 0 }
 0xbfc   :  { %v1624_v45 = vpack.c.b16 %v1623_v40, %v1622_v39  ;;  %v1597_v14 = vunpack.c.l.b16 %v1564_v48 }
 0xbfd   :  { %v1576_v38 = vpop.permute.xlu2 %1575  ;;  %2431 = vmatmul.msk.bf16.vlgmr.msra.gmra.mxu1 %vm808_vm10, %v1649_v44 }
 0xbfe   :  { %2430 = vmatmul.msk.bf16.vlgmr.msrb.gmra.mxu0 %vm808_vm10, %v1624_v45  ;;  %1588 = vmatpush.bf16.msrb.mxu2 %v1576_v38  ;;  %v1599_v53 = vpack.c.b16 %v1598_v50, %v1597_v14 }
 0xc05   :  { %v1601_v41 = vpop.permute.xlu1 %1600 }
 0xc06   :  { %1613 = vmatpush.bf16.msrb.mxu3 %v1601_v41 }
 0xc09   :  { %2429 = vmatmul.msk.bf16.vlgmr.msrb.gmra.mxu3 %vm808_vm10, %v1599_v53 }
 0xc13   :  { %v1524_v51 = vpop.xlane.xlu0 %1523 }
 0xc14   :  { %2732 = vrcp.f32 %v1524_v51 }
 0xc1a   :  { %v2733_v52 = vpop.eup %2732 }
 0xc1b   :  { %v1554_v42 = vmul.f32 %v2733_v52, %v3330_v1  ;;  %v2574_v52 = vld [vmem:[%s3487_s2 + $0x58] sm:$0xf0] }
 0xc1d   :  { %v1562_v55 = vpack.c.bf16 %v1554_v42, %v1554_v42 }
 0xc1f   :  { %v1572_v31 = vunpack.c.l.b16 %v1562_v55 }
 0xc30   :  { %v1527_v54 = vpop.xlane.xlu1 %1526 }
 0xc31   :  { %2734 = vrcp.f32 %v1527_v54  ;;  %v2447_v54 = vld [vmem:[%s3487_s2 + $0x50] sm:$0xf] }
 0xc32   :  { %v2448_v42 = vor.u32 %v2574_v52, %v2447_v54 }
 0xc34   :  { %1804 = vmatpush.bf16.msra.mxu3 %v2448_v42 }
 0xc37   :  { %v2735_v49 = vpop.eup %2734 }
 0xc38   :  { %v1555_v56 = vmul.f32 %v2735_v49, %v1515_v4  ;;  %v2439_v4 = vor.u32 %v2572_v2, %v2436_v3 }
 0xc3a   :  { %v1563_v6 = vpack.c.bf16 %v1555_v56, %v1555_v56  ;;  %1718 = vmatpush.bf16.msra.mxu2 %v2439_v4  ;;  %v2443_v56 = vld [vmem:[%s3487_s2 + $0x38] sm:$0xf] }
 0xc3c   :  { %v1573_v32 = vunpack.c.l.b16 %v1563_v6  ;;  %v2571_v6 = vld [vmem:[%s3487_s2 + $0x40] sm:$0xf0] }
 0xc3e   :  { %v1574_v19 = vpack.c.b16 %v1573_v32, %v1572_v31  ;;  %1719 = vmatpush.bf16.msra.mxu2 %v2435_v7  ;;  %v2444_v32 = vor.u32 %v2571_v6, %v2443_v56  ;;  %v1775_v7 = vperm.slane %v3368_v35, 1 }
 0xc40   :  { %2428 = vmatmul.msk.bf16.vlgmr.msrb.gmra.mxu2 %vm808_vm10, %v1574_v19  ;;  %1805 = vmatpush.bf16.msra.mxu3 %v2444_v32 }
 0xc7a   :  { %v1665_v20 = vpop.f32.mrf.mxu1 }
 0xc7b   :  { %v1640_v12 = vpop.f32.mrf.mxu0 }
 0xc82   :  { %v1667_v1 = vpop.f32.mrf.mxu1 }
 0xc83   :  { %v1642_v59 = vpop.f32.mrf.mxu0  ;;  %v2648_v26 = vpack.i.bf16 %v1667_v1, %v1665_v20 }
 0xc84   :  { %v2638_v60 = vpack.i.bf16 %v1642_v59, %v1640_v12 }
 0xc86   :  { %2639 = vrot.lane.b32.xlu2 %v2638_v60, %s2786_s29 }
 0xc8c   :  { %v1615_v61 = vpop.f32.mrf.mxu3 }
 0xc94   :  { %v1617_v62 = vpop.f32.mrf.mxu3 }
 0xc95   :  { %v2643_v0 = vpack.i.bf16 %v1617_v62, %v1615_v61 }
 0xc97   :  { %2644 = vrot.lane.b32.xlu2 %v2643_v0, %s2785_s1 }
 0xc9f   :  { %2649 = vrot.lane.b32.xlu2 %v2648_v26, %s2787_s30 }
 0xcc3   :  { %v1590_v9 = vpop.f32.mrf.mxu2 }
 0xccb   :  { %v1592_v11 = vpop.f32.mrf.mxu2 }
 0xce0   :  { %v2640_v8 = vpop.permute.xlu2 %2639 }
 0xce1   :  { %v2642_v25 = vunpack.i.h.bf16 %v2640_v8  ;;  %v2641_v18 = vunpack.i.l.bf16 %v2640_v8 }
 0xcf1   :  { %v2645_v58 = vpop.permute.xlu2 %2644 }
 0xcf2   :  { %v2647_v15 = vunpack.i.h.bf16 %v2645_v58  ;;  %v2646_v10 = vunpack.i.l.bf16 %v2645_v58 }
 0xcf4   :  { %v1694_v13 = vsel %vm671_vm8, %v1590_v9, %v2646_v10  ;;  %v1695_v17 = vsel %vm671_vm8, %v1592_v11, %v2647_v15  ;;  %v1778_v15 = vperm.slane %v3368_v35, 2 }
 0xcf5   :  { %v1696_v29 = vsel %vm808_vm10, %v1694_v13, %v2641_v18  ;;  %v1697_v30 = vsel %vm808_vm10, %v1695_v17, %v2642_v25 }
 0xcf9   :  { %v2650_v22 = vpop.permute.xlu2 %2649 }
 0xcfa   :  { %v2652_v23 = vunpack.i.h.bf16 %v2650_v22  ;;  %v2651_v24 = vunpack.i.l.bf16 %v2650_v22  ;;  %v2752_v22 = vld [vmem:[%s3490_s5] sm:$0xff] }
 0xcfc   :  { %v1698_v21 = vsel %vm985_vm11, %v1696_v29, %v2651_v24  ;;  %v1699_v33 = vsel %vm985_vm11, %v1697_v30, %v2652_v23  ;;  %v1782_v23 = vperm.slane %v2752_v22, 3  ;;  %v2582_v30 = vld [vmem:[%s3488_s3 + $0x78] sm:$0xff] }
 0xcfd   :  { %v1700_v34 = vpack.c.bf16 %v1699_v33, %v1698_v21  ;;  %1966 = vmatpush.bf16.msra.mxu0 %v2582_v30 }
 0xcff   :  { %2440 = vmatmul.msk.bf16.vlgmr.msra.gmra.mxu2 %vm547_vm0, %v1700_v34  ;;  %v2581_v34 = vld [vmem:[%s3488_s3 + $0x70] sm:$0xff] }
 0xd01   :  { %1967 = vmatpush.bf16.msra.mxu0 %v2581_v34 }
 0xd82   :  { %v1721_v16 = vpop.f32.mrf.mxu2 }
 0xd83   :  { %v1726_v37 = vadd.f32 %v1721_v16, %v3244_v57 }
 0xd85   :  { %v3372_v39 = vadd.f32 %v1728_v28, %v1726_v37 }
 0xd87   :  { %v1731_v40 = vsel %vm547_vm0, %v3372_v39, 0.0 }
 0xd88   :  { %1732 = vadd.xlane.f32.xlu2 %v1731_v40 }
 0xd8a   :  { %v1723_v43 = vpop.f32.mrf.mxu2 }
 0xd8b   :  { %v1727_v44 = vadd.f32 %v1723_v43, %v3249_v27 }
 0xd8d   :  { %v3377_v45 = vadd.f32 %v1728_v28, %v1727_v44  ;;  %v2580_v44 = vld [vmem:[%s3488_s3 + $0x68] sm:$0xff] }
 0xd8e   :  { %1968 = vmatpush.bf16.msra.mxu0 %v2580_v44 }
 0xd8f   :  { %v1734_v46 = vsel %vm547_vm0, %v3377_v45, 0.0 }
 0xd90   :  { %1735 = vadd.xlane.f32.xlu0 %v1734_v46 }
 0xdfb   :  { %v1733_v38 = vpop.xlane.xlu2 %1732 }
 0xdfc   :  { %v1737_v47 = vmul.f32 %v1733_v38, %v3023_v36 }
 0xdfe   :  { %v1739_v57 = vsub.f32 %v3372_v39, %v1737_v47 }
 0xe00   :  { %v1741_v48 = vmul.f32 %v1739_v57, %v1739_v57 }
 0xe02   :  { %v1743_v50 = vsel %vm547_vm0, %v1741_v48, 0.0  ;;  %v2579_v48 = vld [vmem:[%s3488_s3 + $0x60] sm:$0xff] }
 0xe03   :  { %1744 = vadd.xlane.f32.xlu1 %v1743_v50  ;;  %v1736_v14 = vpop.xlane.xlu0 %1735  ;;  %1969 = vmatpush.bf16.msra.mxu0 %v2579_v48 }
 0xe04   :  { %v1738_v41 = vmul.f32 %v1736_v14, %v3023_v36 }
 0xe06   :  { %v1740_v27 = vsub.f32 %v3377_v45, %v1738_v41 }
 0xe08   :  { %v1742_v53 = vmul.f32 %v1740_v27, %v1740_v27 }
 0xe0a   :  { %v1746_v51 = vsel %vm547_vm0, %v1742_v53, 0.0 }
 0xe0b   :  { %1747 = vadd.xlane.f32.xlu0 %v1746_v51  ;;  %v2578_v51 = vld [vmem:[%s3488_s3 + $0x58] sm:$0xff] }
 0xe0c   :  { %1970 = vmatpush.bf16.msra.mxu0 %v2578_v51 }
 0xe76   :  { %v1745_v49 = vpop.xlane.xlu1 %1744 }
 0xe77   :  { %v1749_v55 = vmul.f32 %v1745_v49, %v3023_v36 }
 0xe79   :  { %v1751_v31 = vadd.f32 1e-06, %v1749_v55 }
 0xe7b   :  { %2736 = vrsqrt.f32 %v1751_v31  ;;  %vm1759_vm10 = vweird.f32 %v1751_v31 }
 0xe7e   :  { %v1748_v19 = vpop.xlane.xlu0 %1747 }
 0xe7f   :  { %v1750_v12 = vmul.f32 %v1748_v19, %v3023_v36 }
 0xe81   :  { %v2737_v59 = vpop.eup %2736  ;;  %v1752_v60 = vadd.f32 1e-06, %v1750_v12 }
 0xe82   :  { %v1754_v61 = vmul.f32 %v2737_v59, %v1751_v31  ;;  %vm1760_vm8 = vweird.f32 %v2737_v59  ;;  %v2577_v31 = vld [vmem:[%s3488_s3 + $0x50] sm:$0xff] }
 0xe83   :  { %2738 = vrsqrt.f32 %v1752_v60  ;;  %vm1761_vm11 = vmor %vm1759_vm10, %vm1760_vm8  ;;  %vm1769_vm6 = vweird.f32 %v1752_v60  ;;  %1971 = vmatpush.bf16.msra.mxu0 %v2577_v31  ;;  %vm1990_vm8 = vcmask 254976  }
 0xe84   :  { %v1755_v20 = vmul.f32 %v2737_v59, %v1754_v61 }
 0xe86   :  { %v1756_v62 = vmul.f32 0.5, %v1755_v20 }
 0xe88   :  { %v1757_v0 = vsub.f32 1.5, %v1756_v62  ;;  %v2576_v62 = vld [vmem:[%s3488_s3 + $0x48] sm:$0xff] }
 0xe89   :  { %v2739_v1 = vpop.eup %2738  ;;  %1972 = vmatpush.bf16.msra.mxu0 %v2576_v62 }
 0xe8a   :  { %v1758_v26 = vmul.f32 %v2737_v59, %v1757_v0  ;;  %v1764_v2 = vmul.f32 %v2739_v1, %v1752_v60  ;;  %vm1770_vm5 = vweird.f32 %v2739_v1 }
 0xe8b   :  { %vm1771_vm7 = vmor %vm1769_vm6, %vm1770_vm5 }
 0xe8c   :  { %v1765_v3 = vmul.f32 %v2739_v1, %v1764_v2  ;;  %v1762_v4 = vsel %vm1761_vm11, %v2737_v59, %v1758_v26 }
 0xe8d   :  { %v1773_v8 = vmul.f32 %v1762_v4, %v1739_v57  ;;  %v2575_v4 = vld [vmem:[%s3488_s3 + $0x40] sm:$0xff] }
 0xe8e   :  { %v1766_v5 = vmul.f32 0.5, %v1765_v3  ;;  %1973 = vmatpush.bf16.msra.mxu0 %v2575_v4 }
 0xe8f   :  { %v1776_v10 = vmul.f32 %v1775_v7, %v1773_v8 }
 0xe90   :  { %v1767_v63 = vsub.f32 1.5, %v1766_v5 }
 0xe91   :  { %v1779_v17 = vadd.f32 %v1778_v15, %v1776_v10 }
 0xe92   :  { %v1768_v9 = vmul.f32 %v2739_v1, %v1767_v63 }
 0xe94   :  { %v1772_v58 = vsel %vm1771_vm7, %v2739_v1, %v1768_v9 }
 0xe95   :  { %v1774_v11 = vmul.f32 %v1772_v58, %v1740_v27 }
 0xe97   :  { %v1777_v13 = vmul.f32 %v1775_v7, %v1774_v11 }
 0xe99   :  { %v1780_v25 = vadd.f32 %v1778_v15, %v1777_v13 }
 0xe9b   :  { %v1781_v18 = vpack.c.bf16 %v1780_v25, %v1779_v17 }
 0xe9d   :  { %2449 = vmatmul.msk.bf16.vlgmr.msra.gmra.mxu3 %vm547_vm0, %v1781_v18 }
 0xf20   :  { %v1807_v24 = vpop.f32.mrf.mxu3 }
 0xf21   :  { %v3407_v29 = vadd.f32 %v1807_v24, %v1782_v23 }
 0xf23   :  { %v3413_v21 = vmul.f32 0.70710677, %v3407_v29 }
 0xf25   :  { %v1816_v33 = vmul.f32 %v3413_v21, %v3413_v21 }
 0xf27   :  { %v1817_v28 = vmin.f32 %v1816_v33, 16.0 }
 0xf28   :  { %v1809_v16 = vpop.f32.mrf.mxu3 }
 0xf29   :  { %v1818_v37 = vmul.f32 2.1237322e-06, %v1817_v28  ;;  %v1829_v40 = vmul.f32 3.8918573e-05, %v1817_v28  ;;  %v3420_v43 = vadd.f32 %v1809_v16, %v1782_v23 }
 0xf2b   :  { %v1819_v46 = vadd.f32 0.00028619796, %v1818_v37  ;;  %v1830_v38 = vadd.f32 0.001143296, %v1829_v40  ;;  %v3426_v47 = vmul.f32 0.70710677, %v3420_v43 }
 0xf2d   :  { %v1831_v57 = vmul.f32 %v1830_v38, %v1817_v28  ;;  %v1856_v50 = vmul.f32 %v3426_v47, %v3426_v47  ;;  %v1820_v14 = vmul.f32 %v1819_v46, %v1817_v28 }
 0xf2f   :  { %v1832_v41 = vadd.f32 0.014752088, %v1831_v57  ;;  %v1857_v27 = vmin.f32 %v1856_v50, 16.0  ;;  %v1821_v42 = vadd.f32 0.0036580483, %v1820_v14 }
 0xf31   :  { %v1833_v53 = vmul.f32 %v1832_v41, %v1817_v28  ;;  %v1858_v54 = vmul.f32 2.1237322e-06, %v1857_v27  ;;  %v1869_v52 = vmul.f32 3.8918573e-05, %v1857_v27  ;;  %v1822_v12 = vmul.f32 %v1821_v42, %v1817_v28 }
 0xf33   :  { %v1834_v49 = vadd.f32 0.112945676, %v1833_v53  ;;  %v1859_v55 = vadd.f32 0.00028619796, %v1858_v54  ;;  %v1870_v56 = vadd.f32 0.001143296, %v1869_v52 }
 0xf34   :  { %v1823_v1 = vadd.f32 0.05243302, %v1822_v12 }
 0xf35   :  { %v1835_v6 = vmul.f32 %v1834_v49, %v1817_v28  ;;  %v1860_v32 = vmul.f32 %v1859_v55, %v1857_v27  ;;  %v1871_v19 = vmul.f32 %v1870_v56, %v1857_v27  ;;  %v1812_v56 = vmul.f32 0.5, %v3407_v29 }
 0xf36   :  { %v1824_v63 = vmul.f32 %v1823_v1, %v1817_v28 }
 0xf37   :  { %v1836_v59 = vadd.f32 0.4994258, %v1835_v6  ;;  %v1861_v60 = vadd.f32 0.0036580483, %v1860_v32  ;;  %v1872_v61 = vadd.f32 0.014752088, %v1871_v19 }
 0xf38   :  { %v1825_v15 = vadd.f32 0.18741608, %v1824_v63  ;;  %v1813_v6 = vmul.f32 0.5, %v3420_v43 }
 0xf39   :  { %v1837_v20 = vmul.f32 %v1836_v59, %v1817_v28  ;;  %v1873_v0 = vmul.f32 %v1872_v61, %v1857_v27  ;;  %v1862_v2 = vmul.f32 %v1861_v60, %v1857_v27 }
 0xf3a   :  { %v1826_v25 = vmul.f32 %v1825_v15, %v1817_v28 }
 0xf3b   :  { %v1838_v26 = vadd.f32 1.0, %v1837_v20  ;;  %v1874_v3 = vadd.f32 0.112945676, %v1873_v0  ;;  %v1863_v7 = vadd.f32 0.05243302, %v1862_v2 }
 0xf3c   :  { %v1827_v33 = vadd.f32 1.1283791, %v1826_v25  ;;  %v2015_v25 = vperm.slane %v3368_v35, 5 }
 0xf3d   :  { %2740 = vrcp.f32 %v1838_v26  ;;  %v1875_v5 = vmul.f32 %v1874_v3, %v1857_v27  ;;  %v1864_v11 = vmul.f32 %v1863_v7, %v1857_v27  ;;  %v1850_v22 = vand.u32 2147483648, %v1838_v26 }
 0xf3e   :  { %v1848_v24 = vand.u32 2147483647, %v1838_v26  ;;  %vm1844_vm12 = vweird.f32 %v1838_v26  ;;  %v1828_v38 = vmul.f32 %v1827_v33, %v3413_v21 }
 0xf3f   :  { %v1876_v8 = vadd.f32 0.4994258, %v1875_v5  ;;  %v1865_v23 = vadd.f32 0.18741608, %v1864_v11  ;;  %v1851_v37 = vor.u32 1.1754944e-38, %v1850_v22  ;;  %v2013_v11 = vperm.slane %v3368_v35, 4 }
 0xf40   :  { %vm1849_vm14 = vcmp.eq.f32.partialorder %v1848_v24, 8.507059e+37 }
 0xf41   :  { %v1877_v9 = vmul.f32 %v1876_v8, %v1857_v27  ;;  %v1866_v40 = vmul.f32 %v1865_v23, %v1857_v27 }
 0xf43   :  { %v2741_v58 = vpop.eup %2740  ;;  %v1878_v13 = vadd.f32 1.0, %v1877_v9  ;;  %v1867_v28 = vadd.f32 1.1283791, %v1866_v40  ;;  %v2045_v40 = vld [vmem:[%s3491_s6 + $0x10] sm:$0xff] }
 0xf44   :  { %v1840_v10 = vmul.f32 %v2741_v58, %v1838_v26  ;;  %vm1845_vm9 = vweird.f32 %v2741_v58 }
 0xf45   :  { %2742 = vrcp.f32 %v1878_v13  ;;  %vm1846_vm13 = vmor %vm1844_vm12, %vm1845_vm9  ;;  %v1890_v48 = vand.u32 2147483648, %v1878_v13  ;;  %v1888_v41 = vand.u32 2147483647, %v1878_v13  ;;  %vm1884_vm1 = vweird.f32 %v1878_v13 }
 0xf46   :  { %v1841_v17 = vsub.f32 1.0, %v1840_v10  ;;  %v1868_v52 = vmul.f32 %v1867_v28, %v3426_v47  ;;  %v1982_v47 = vperm.slane %v3368_v35, 3  ;;  %vm2073_vm12 = vcmask 123904  }
 0xf47   :  { %v1891_v51 = vor.u32 1.1754944e-38, %v1890_v48  ;;  %vm1889_vm3 = vcmp.eq.f32.partialorder %v1888_v41, 8.507059e+37 }
 0xf48   :  { %v1842_v18 = vmul.f32 %v2741_v58, %v1841_v17 }
 0xf4a   :  { %v1843_v30 = vadd.f32 %v2741_v58, %v1842_v18 }
 0xf4b   :  { %v2743_v34 = vpop.eup %2742 }
 0xf4c   :  { %v1847_v16 = vsel %vm1846_vm13, %v2741_v58, %v1843_v30  ;;  %v1880_v44 = vmul.f32 %v2743_v34, %v1878_v13  ;;  %vm1885_vm15 = vweird.f32 %v2743_v34 }
 0xf4d   :  { %v1852_v46 = vsel %vm1849_vm14, %v1851_v37, %v1847_v16  ;;  %vm1886_vm2 = vmor %vm1884_vm1, %vm1885_vm15  ;;  %v2046_v37 = vld [vmem:[%s3491_s6 + $0x18] sm:$0xff] }
 0xf4e   :  { %v1881_v57 = vsub.f32 1.0, %v1880_v44  ;;  %v1853_v50 = vmul.f32 %v1852_v46, %v1828_v38  ;;  %2064 = vmatpush.msrb.mxu1 %v2046_v37  ;;  %v2044_v44 = vld [vmem:[%s3491_s6 + $0x8] sm:$0xff]  ;;  %v2043_v46 = vld [vmem:[%s3491_s6] sm:$0xff] }
 0xf50   :  { %v1882_v14 = vmul.f32 %v2743_v34, %v1881_v57  ;;  %v2450_v54 = vclamps-f32 %v1853_v50, 1.0  ;;  %2065 = vmatpush.msrb.mxu1 %v2045_v40 }
 0xf52   :  { %v1883_v53 = vadd.f32 %v2743_v34, %v1882_v14  ;;  %v1896_v55 = vadd.f32 1.0, %v2450_v54  ;;  %2066 = vmatpush.msrb.mxu1 %v2044_v44  ;;  %v2039_v54 = vperm.slane %v3368_v35, 6 }
 0xf54   :  { %v1887_v27 = vsel %vm1886_vm2, %v2743_v34, %v1883_v53  ;;  %v1898_v32 = vmul.f32 %v1896_v55, %v1812_v56  ;;  %2067 = vmatpush.msrb.mxu1 %v2043_v46 }
 0xf55   :  { %v1892_v42 = vsel %vm1889_vm3, %v1891_v51, %v1887_v27 }
 0xf56   :  { %v1893_v49 = vmul.f32 %v1892_v42, %v1868_v52  ;;  %v2041_v42 = vperm.slane %v3368_v35, 7 }
 0xf58   :  { %v2451_v21 = vclamps-f32 %v1893_v49, 1.0 }
 0xf5a   :  { %v1897_v31 = vadd.f32 1.0, %v2451_v21 }
 0xf5c   :  { %v1899_v19 = vmul.f32 %v1897_v31, %v1813_v6 }
 0xf5e   :  { %v1900_v12 = vpack.c.bf16 %v1899_v19, %v1898_v32 }
 0xf60   :  { %1974 = vmatmul.bf16.vlgmr.msra.gmra.mxu0 %v1900_v12 }
 0xfdd   :  { %v1975_v59 = vpop.f32.mrf.mxu0 }
 0xfde   :  { %v1980_v61 = vadd.f32 %v1975_v59, %v3372_v39 }
 0xfe0   :  { %v1983_v0 = vadd.f32 %v1982_v47, %v1980_v61 }
 0xfe5   :  { %v1977_v60 = vpop.f32.mrf.mxu0 }
 0xfe6   :  { %v1981_v20 = vadd.f32 %v1977_v60, %v3377_v45 }
 0xfe8   :  { %v1984_v62 = vadd.f32 %v1982_v47, %v1981_v20 }
 0xfea   :  { %v1986_v1 = vrot.slane %v1984_v62, 7 }
 0xfec   :  { %v1989_v29 = vsel %vm1988_vm4, %v1983_v0, %v1986_v1 }
 0xfed   :  { %v1991_v43 = vsel %vm1990_vm8, %v1989_v29, 0.0 }
 0xfee   :  { %1992 = vadd.xlane.f32.xlu1 %v1991_v43 }
0x1061   :  { %v1993_v26 = vpop.xlane.xlu1 %1992 }
0x1062   :  { %v1994_v2 = vmul.f32 %v1993_v26, %v3023_v36 }
0x1064   :  { %v1995_v3 = vsub.f32 %v1989_v29, %v1994_v2 }
0x1066   :  { %v1996_v4 = vmul.f32 %v1995_v3, %v1995_v3 }
0x1068   :  { %v1997_v39 = vsel %vm1990_vm8, %v1996_v4, 0.0 }
0x1069   :  { %1998 = vadd.xlane.f32.xlu0 %v1997_v39 }
0x10dc   :  { %v1999_v5 = vpop.xlane.xlu0 %1998 }
0x10dd   :  { %v2000_v45 = vmul.f32 %v1999_v5, %v3023_v36 }
0x10df   :  { %v2001_v63 = vadd.f32 1e-06, %v2000_v45 }
0x10e1   :  { %2744 = vrsqrt.f32 %v2001_v63  ;;  %vm2008_vm11 = vweird.f32 %v2001_v63 }
0x10e7   :  { %v2745_v7 = vpop.eup %2744 }
0x10e8   :  { %v2003_v8 = vmul.f32 %v2745_v7, %v2001_v63  ;;  %vm2009_vm10 = vweird.f32 %v2745_v7 }
0x10e9   :  { %vm2010_vm5 = vmor %vm2008_vm11, %vm2009_vm10 }
0x10ea   :  { %v2004_v9 = vmul.f32 %v2745_v7, %v2003_v8 }
0x10ec   :  { %v2005_v58 = vmul.f32 0.5, %v2004_v9 }
0x10ee   :  { %v2006_v15 = vsub.f32 1.5, %v2005_v58 }
0x10f0   :  { %v2007_v10 = vmul.f32 %v2745_v7, %v2006_v15 }
0x10f2   :  { %v2011_v13 = vsel %vm2010_vm5, %v2745_v7, %v2007_v10 }
0x10f3   :  { %v2012_v17 = vmul.f32 %v2011_v13, %v1995_v3 }
0x10f5   :  { %v2014_v18 = vmul.f32 %v2013_v11, %v2012_v17 }
0x10f7   :  { %v2016_v22 = vadd.f32 %v2015_v25, %v2014_v18 }
0x10f9   :  { %v2017_v23 = vsel %vm1990_vm8, %v2016_v22, 0.0 }
0x10fa   :  { %2018 = vadd.xlane.f32.xlu1 %v2017_v23 }
0x116d   :  { %v2019_v24 = vpop.xlane.xlu1 %2018 }
0x116e   :  { %v2020_v30 = vmul.f32 %v2019_v24, %v3023_v36 }
0x1170   :  { %v2021_v33 = vsub.f32 %v2016_v22, %v2020_v30 }
0x1172   :  { %v2022_v34 = vmul.f32 %v2021_v33, %v2021_v33 }
0x1174   :  { %v2023_v16 = vsel %vm1990_vm8, %v2022_v34, 0.0 }
0x1175   :  { %2024 = vadd.xlane.f32.xlu0 %v2023_v16 }
0x11e8   :  { %v2025_v38 = vpop.xlane.xlu0 %2024 }
0x11e9   :  { %v2026_v57 = vmul.f32 %v2025_v38, %v3023_v36  ;;  %v2653_v36 = vld [vmem:[%s3491_s6 + $0x20] ss:$0 sm:$0xff]  ;;  %s2788_s6 = smov [#allocation2]  }
0x11ea   :  { %s2111_s25 = sshll.u32 %s2788_s6, 4  ;;  %s2112_s25 = int_to_ptr.vmem [resolvable:$true] %s2111_s25 }
0x11eb   :  { %v2027_v28 = vadd.f32 1e-05, %v2026_v57 }
0x11ed   :  { %2746 = vrsqrt.f32 %v2027_v28  ;;  %vm2034_vm7 = vweird.f32 %v2027_v28 }
0x11f3   :  { %v2747_v48 = vpop.eup %2746 }
0x11f4   :  { %v2029_v50 = vmul.f32 %v2747_v48, %v2027_v28  ;;  %vm2035_vm6 = vweird.f32 %v2747_v48 }
0x11f5   :  { %vm2036_vm9 = vmor %vm2034_vm7, %vm2035_vm6 }
0x11f6   :  { %v2030_v14 = vmul.f32 %v2747_v48, %v2029_v50 }
0x11f8   :  { %v2031_v41 = vmul.f32 0.5, %v2030_v14 }
0x11fa   :  { %v2032_v53 = vsub.f32 1.5, %v2031_v41 }
0x11fc   :  { %v2033_v51 = vmul.f32 %v2747_v48, %v2032_v53 }
0x11fe   :  { %v2037_v52 = vsel %vm2036_vm9, %v2747_v48, %v2033_v51 }
0x11ff   :  { %v2038_v27 = vmul.f32 %v2037_v52, %v2021_v33 }
0x1201   :  { %v2040_v49 = vmul.f32 %v2039_v54, %v2038_v27 }
0x1203   :  { %v2042_v55 = vadd.f32 %v2041_v42, %v2040_v49 }
0x1205   :  { %2500 = vmatmul.msk.f32.vlgmr.msrb.gmra.mxu1 %vm547_vm0, %v2042_v55 }
0x1282   :  { %v2069_v21 = vpop.f32.mrf.mxu1 }
0x1283   :  { %v2070_v56 = vadd.f32 %v2653_v36, %v2069_v21 }
0x1285   :  { %v2072_v6 = vmul.f32 %v2070_v56, %v2070_v56 }
0x1287   :  { %v2074_v31 = vsel %vm2073_vm12, %v2072_v6, 0.0 }
0x1288   :  { %2075 = vadd.xlane.f32.xlu1 %v2074_v31 }
0x12fb   :  { %v2076_v32 = vpop.xlane.xlu1 %2075 }
0x12fc   :  { %2748 = vrsqrt.f32 %v2076_v32  ;;  %vm2084_vm0 = vcmp.eq.f32.partialorder %v2076_v32, inf  ;;  %v2087_v20 = vand.u32 2147483648, %v2076_v32  ;;  %vm2086_vm13 = vcmp.eq.f32.partialorder %v2076_v32, 0.0 }
0x1302   :  { %v2749_v19 = vpop.eup %2748 }
0x1303   :  { %v2078_v12 = vmul.f32 %v2749_v19, %v2076_v32 }
0x1305   :  { %v2079_v35 = vmul.f32 %v2749_v19, %v2078_v12 }
0x1307   :  { %v2080_v59 = vmul.f32 0.5, %v2079_v35 }
0x1309   :  { %v2081_v60 = vsub.f32 1.5, %v2080_v59 }
0x130b   :  { %v2082_v61 = vmul.f32 %v2749_v19, %v2081_v60 }
0x130d   :  { %v2083_v47 = vmul.f32 %v2082_v61, %v2076_v32 }
0x130f   :  { %v2085_v62 = vsel %vm2084_vm0, %v2076_v32, %v2083_v47 }
0x1310   :  { %v2088_v0 = vsel %vm2086_vm13, %v2087_v20, %v2085_v62 }
0x1311   :  { %v2089_v1 = vmax.f32 %v2088_v0, 1e-12 }
0x1313   :  { %2750 = vrcp.f32 %v2089_v1  ;;  %v2101_v2 = vand.u32 2147483648, %v2089_v1  ;;  %v2099_v4 = vand.u32 2147483647, %v2089_v1  ;;  %vm2095_vm15 = vweird.f32 %v2089_v1 }
0x1315   :  { %v2102_v5 = vor.u32 1.1754944e-38, %v2101_v2  ;;  %vm2100_vm2 = vcmp.eq.f32.partialorder %v2099_v4, 8.507059e+37 }
0x1319   :  { %v2751_v29 = vpop.eup %2750 }
0x131a   :  { %v2091_v43 = vmul.f32 %v2751_v29, %v2089_v1  ;;  %vm2096_vm14 = vweird.f32 %v2751_v29 }
0x131b   :  { %vm2097_vm1 = vmor %vm2095_vm15, %vm2096_vm14 }
0x131c   :  { %v2092_v26 = vsub.f32 1.0, %v2091_v43 }
0x131e   :  { %v2093_v3 = vmul.f32 %v2751_v29, %v2092_v26 }
0x1320   :  { %v2094_v39 = vadd.f32 %v2751_v29, %v2093_v3 }
0x1322   :  { %v2098_v45 = vsel %vm2097_vm1, %v2751_v29, %v2094_v39 }
0x1323   :  { %v2103_v63 = vsel %vm2100_vm2, %v2102_v5, %v2098_v45 }
0x1324   :  { %v2104_v7 = vmul.f32 %v2103_v63, %v2070_v56 }
0x1326   :  { %2105 = vst.msk [vmem:[#allocation2] sm:$0x3] %vm2073_vm12, %v2104_v7 }
0x1327   :  { %2116 = dma.vmem_to_hbm [thread:$0]  %s2112_s25, 32, %s2114_s27, [#allocation3]  }
0x1328   :  { %2777 = dma.done.wait [#allocation3], 32  }
0x1329   :  { %2778 = vsyncadd [#allocation3], 4294967264 }
0x132a   :  { %2121 = vsyncpa [#allocation3], 1 }

</bundles_post_ra>
